<compile_context>
chip_gen: v6e
topology: v6e:2x2x1
jax: 0.10.0
libtpu: 0.0.40
codegen_flags: <defaults>
</compile_context>

<pallas_src>
import functools
import math

import jax
import jax.numpy as jnp
from jax.experimental import pallas as pl
from jax.experimental.pallas import tpu as pltpu


def encoder_kernel(
    x_ref,
    wq_ref, bq_ref, wk_ref, bk_ref, wv_ref, bv_ref, wo_ref, bo_ref,
    g1_ref, be1_ref,
    w1_ref, b1_ref, w2_ref, b2_ref,
    g2_ref, be2_ref,
    o_ref,
    *, d_model: int, num_heads: int, eps: float,
):
    bf = jnp.bfloat16
    TQ, Dm = o_ref.shape            # q-tile rows, padded model dim (lane-dense)
    S = x_ref.shape[0]              # full sequence length
    H = num_heads
    dh = d_model // H               # true per-head dim
    scale = 1.0 / math.sqrt(dh)
    inv_d = 1.0 / d_model           # LayerNorm divisor uses TRUE d_model

    # One x operand: full (S, Dm) block for keys/values; slice the query rows.
    q_start = pl.multiple_of(pl.program_id(1) * TQ, TQ)
    x_all = x_ref[...]                                   # (S,  Dm) f32
    xq = x_ref[pl.ds(q_start, TQ), :]                    # (TQ, Dm) f32

    x_all_b = x_all.astype(bf)
    xq_b = xq.astype(bf)

    # ---- QKV projections: bf16 MXU matmuls, f32 accumulation ---------------
    # wq/wk/wv are (Dm, d_model): padded input rows are zero -> exact result.
    q = jnp.dot(xq_b, wq_ref[...], preferred_element_type=jnp.float32) + bq_ref[...]
    k = jnp.dot(x_all_b, wk_ref[...], preferred_element_type=jnp.float32) + bk_ref[...]
    v = jnp.dot(x_all_b, wv_ref[...], preferred_element_type=jnp.float32) + bv_ref[...]
    q = q * scale                                        # fold softmax scale into q

    # heads-major layout -> ALL heads through one batched contraction.
    qh = jnp.transpose(q.reshape(TQ, H, dh), (1, 0, 2)).astype(bf)   # (H, TQ, dh)
    kh = jnp.transpose(k.reshape(S, H, dh), (1, 0, 2)).astype(bf)    # (H, S,  dh)
    vh = jnp.transpose(v.reshape(S, H, dh), (1, 0, 2)).astype(bf)    # (H, S,  dh)

    scores = jnp.einsum("hqd,hkd->hqk", qh, kh,
                        preferred_element_type=jnp.float32)          # (H, TQ, S) f32
    scores = scores - jnp.max(scores, axis=-1, keepdims=True)
    p = jnp.exp(scores)                                              # f32, <= 1
    denom = jnp.sum(p, axis=-1, keepdims=True)                       # (H, TQ, 1)
    ctx = jnp.einsum("hqk,hkd->hqd", p.astype(bf), vh,
                     preferred_element_type=jnp.float32)             # (H, TQ, dh)
    # normalize the small (H, TQ, dh) context, not the (H, TQ, S) probs
    ctx = ctx * pl.reciprocal(denom, approx=True)

    attn = jnp.transpose(ctx, (1, 0, 2)).reshape(TQ, H * dh)         # (TQ, d_model)
    # wo is (d_model, Dm): padded output cols/bias are zero -> pad lanes stay 0.
    mha = jnp.dot(attn.astype(bf), wo_ref[...],
                  preferred_element_type=jnp.float32) + bo_ref[...]

    # ---- LayerNorm over the TRUE d_model lanes (padded lanes are zero) -----
    lane = jax.lax.broadcasted_iota(jnp.int32, (1, Dm), 1)
    mask = (lane < d_model).astype(jnp.float32)

    def layer_norm(y, gamma, beta):
        # padded lanes of y are exactly zero, so the un-masked sum is correct
        mean = jnp.sum(y, axis=-1, keepdims=True) * inv_d
        cen = (y - mean) * mask
        var = jnp.sum(cen * cen, axis=-1, keepdims=True) * inv_d
        return cen * jax.lax.rsqrt(var + eps) * gamma + beta   # pads -> 0 (gamma=beta=0)

    x1 = layer_norm(xq + mha, g1_ref[...], be1_ref[...])

    # ---- Feed-forward (padded d_ff cols/rows are zero -> exact) ------------
    hdn = jnp.dot(x1.astype(bf), w1_ref[...],
                  preferred_element_type=jnp.float32) + b1_ref[...]
    hdn = jnp.maximum(hdn, 0.0)                                      # ReLU
    ff = jnp.dot(hdn.astype(bf), w2_ref[...],
                 preferred_element_type=jnp.float32) + b2_ref[...]

    out = layer_norm(x1 + ff, g2_ref[...], be2_ref[...])
    o_ref[...] = out.astype(o_ref.dtype)


def _round_up(n, m):
    return ((n + m - 1) // m) * m


def _choose_q_tile(S):
    # Largest of these that evenly divides S; fall back to the full sequence.
    for t in (512, 256, 128, 64, 32, 16, 8):
        if S >= t and S % t == 0:
            return t
    return S


def encoder_forward(x, params, *, num_heads, eps=1e-5):
    B, S, D = x.shape
    assert D % num_heads == 0, "d_model must be divisible by num_heads"
    d_ff = params["w1"].shape[1]

    Dm = _round_up(D, 128)      # padded model dim  (lane-dense loads/stores)
    Fp = _round_up(d_ff, 128)   # padded ff dim
    tq = _choose_q_tile(S)
    n_q_tiles = S // tq

    bf = jnp.bfloat16

    def pad2(a, rows, cols):
        return jnp.pad(a, ((0, rows - a.shape[0]), (0, cols - a.shape[1])))

    # Zero-pad x along the model dim; padded lanes stay zero end-to-end.
    x_p = jnp.pad(x, ((0, 0), (0, 0), (0, Dm - D)))

    # Weight matrices in bf16 (halves VMEM/DMA bytes; MXU-native).  Biases and
    # layernorm params stay f32.  Padding keeps true head structure intact:
    #   wq/wk/wv : pad input rows  D->Dm (out cols stay true d_model)
    #   wo       : pad output cols D->Dm
    #   w1/w2    : pad to (Dm, Fp) / (Fp, Dm)
    wq = pad2(params["wq"], Dm, D).astype(bf)
    wk = pad2(params["wk"], Dm, D).astype(bf)
    wv = pad2(params["wv"], Dm, D).astype(bf)
    wo = pad2(params["wo"], D, Dm).astype(bf)
    bo = pad2(params["bo"], 1, Dm)
    w1 = pad2(params["w1"], Dm, Fp).astype(bf)
    b1 = pad2(params["b1"], 1, Fp)
    w2 = pad2(params["w2"], Fp, Dm).astype(bf)
    b2 = pad2(params["b2"], 1, Dm)
    g1 = pad2(params["g1"], 1, Dm)
    be1 = pad2(params["be1"], 1, Dm)
    g2 = pad2(params["g2"], 1, Dm)
    be2 = pad2(params["be2"], 1, Dm)
    bq, bk, bv = params["bq"], params["bk"], params["bv"]   # (1, D) f32

    # Params: whole-array VMEM residents -> single-buffered (the blocked x
    # input is double-buffered by the pipeline; constants don't need it).
    vmem_full = pl.BlockSpec(memory_space=pltpu.MemorySpace.VMEM)

    in_specs = [
        # full sequence of this batch element (queries sliced in-kernel)
        pl.BlockSpec((pl.Squeezed(), S, Dm), lambda b, qi: (b, 0, 0)),
    ] + [vmem_full] * 16

    kernel = functools.partial(encoder_kernel, d_model=D, num_heads=num_heads,
                               eps=eps)

    out_p = pl.pallas_call(
        kernel,
        out_shape=jax.ShapeDtypeStruct((B, S, Dm), jnp.float32),
        grid_spec=pltpu.PrefetchScalarGridSpec(
            num_scalar_prefetch=0,
            grid=(B, n_q_tiles),
            in_specs=in_specs,
            out_specs=pl.BlockSpec((pl.Squeezed(), tq, Dm),
                                   lambda b, qi: (b, qi, 0)),
        ),
        compiler_params=pltpu.CompilerParams(
            dimension_semantics=("parallel", "parallel"),
            vmem_limit_bytes=64 * 1024 * 1024,
        ),
    )(
        x_p,
        wq, bq, wk, bk, wv, bv, wo, bo,
        g1, be1,
        w1, b1, w2, b2,
        g2, be2,
    )
    return out_p[..., :D]


def encoder_reference(x, params, *, num_heads, eps=1e-5):
    """Pure-JAX f32 reference matching the PyTorch Encoder forward."""
    B, S, D = x.shape
    dh = D // num_heads

    def proj(v, w, b):
        return v @ w + b[0]

    q = proj(x, params["wq"], params["bq"])
    k = proj(x, params["wk"], params["bk"])
    v = proj(x, params["wv"], params["bv"])
    q = q.reshape(B, S, num_heads, dh).transpose(0, 2, 1, 3)
    k = k.reshape(B, S, num_heads, dh).transpose(0, 2, 1, 3)
    v = v.reshape(B, S, num_heads, dh).transpose(0, 2, 1, 3)
    scores = jnp.einsum("bhqd,bhkd->bhqk", q, k) / math.sqrt(dh)
    p = jax.nn.softmax(scores, axis=-1)
    attn = jnp.einsum("bhqk,bhkd->bhqd", p, v).transpose(0, 2, 1, 3).reshape(B, S, D)
    mha = proj(attn, params["wo"], params["bo"])

    def ln(t, g, b):
        mean = jnp.mean(t, axis=-1, keepdims=True)
        var = jnp.mean((t - mean) ** 2, axis=-1, keepdims=True)
        return (t - mean) / jnp.sqrt(var + eps) * g[0] + b[0]

    x1 = ln(x + mha, params["g1"], params["be1"])
    ff = jnp.maximum(proj(x1, params["w1"], params["b1"]), 0.0)
    ff = proj(ff, params["w2"], params["b2"])
    return ln(x1 + ff, params["g2"], params["be2"])


def make_params(key, d_model, d_ff):
    keys = jax.random.split(key, 12)
    s = 1.0 / math.sqrt(d_model)
    sf = 1.0 / math.sqrt(d_ff)
    return {
        "wq": jax.random.uniform(keys[0], (d_model, d_model), jnp.float32, -s, s),
        "bq": jax.random.uniform(keys[1], (1, d_model), jnp.float32, -s, s),
        "wk": jax.random.uniform(keys[2], (d_model, d_model), jnp.float32, -s, s),
        "bk": jax.random.uniform(keys[3], (1, d_model), jnp.float32, -s, s),
        "wv": jax.random.uniform(keys[4], (d_model, d_model), jnp.float32, -s, s),
        "bv": jax.random.uniform(keys[5], (1, d_model), jnp.float32, -s, s),
        "wo": jax.random.uniform(keys[6], (d_model, d_model), jnp.float32, -s, s),
        "bo": jax.random.uniform(keys[7], (1, d_model), jnp.float32, -s, s),
        "g1": jnp.ones((1, d_model), jnp.float32),
        "be1": jnp.zeros((1, d_model), jnp.float32),
        "w1": jax.random.uniform(keys[8], (d_model, d_ff), jnp.float32, -s, s),
        "b1": jax.random.uniform(keys[9], (1, d_ff), jnp.float32, -s, s),
        "w2": jax.random.uniform(keys[10], (d_ff, d_model), jnp.float32, -sf, sf),
        "b2": jax.random.uniform(keys[11], (1, d_model), jnp.float32, -sf, sf),
        "g2": jnp.ones((1, d_model), jnp.float32),
        "be2": jnp.zeros((1, d_model), jnp.float32),
    }


if __name__ == "__main__":
    B, S, D, H, D_FF = 2, 8, 32, 4, 64
    key = jax.random.PRNGKey(0)
    kx, kp = jax.random.split(key)
    x = jax.random.normal(kx, (B, S, D), jnp.float32)
    params = make_params(kp, D, D_FF)

    out = encoder_forward(x, params, num_heads=H, eps=1e-5)
    out = jax.block_until_ready(out)

    ref = encoder_reference(x, params, num_heads=H, eps=1e-5)
    assert out.shape == (B, S, D)
    max_err = float(jnp.max(jnp.abs(out - ref)))
    # bf16 matmuls + approx reciprocal vs. the f32 reference -> loosened tol
    assert jnp.allclose(out, ref, atol=5e-2, rtol=5e-2), (
        f"mismatch vs JAX reference, max_abs_err={max_err}"
    )

    print("KERNEL_OK")
</pallas_src>

<mosaic_0001>
module attributes {stable_mosaic.version = 11 : i64} {
  func.func @encoder_kernel(%arg0: i32, %arg1: i32, %arg2: memref<1x8x128xf32, #tpu.memory_space<vmem>>, %arg3: memref<128x32xbf16, #tpu.memory_space<vmem>>, %arg4: memref<1x32xf32, #tpu.memory_space<vmem>>, %arg5: memref<128x32xbf16, #tpu.memory_space<vmem>>, %arg6: memref<1x32xf32, #tpu.memory_space<vmem>>, %arg7: memref<128x32xbf16, #tpu.memory_space<vmem>>, %arg8: memref<1x32xf32, #tpu.memory_space<vmem>>, %arg9: memref<32x128xbf16, #tpu.memory_space<vmem>>, %arg10: memref<1x128xf32, #tpu.memory_space<vmem>>, %arg11: memref<1x128xf32, #tpu.memory_space<vmem>>, %arg12: memref<1x128xf32, #tpu.memory_space<vmem>>, %arg13: memref<128x128xbf16, #tpu.memory_space<vmem>>, %arg14: memref<1x128xf32, #tpu.memory_space<vmem>>, %arg15: memref<128x128xbf16, #tpu.memory_space<vmem>>, %arg16: memref<1x128xf32, #tpu.memory_space<vmem>>, %arg17: memref<1x128xf32, #tpu.memory_space<vmem>>, %arg18: memref<1x128xf32, #tpu.memory_space<vmem>>, %arg19: memref<1x8x128xf32, #tpu.memory_space<vmem>>) attributes {dimension_semantics = [#tpu.dimension_semantics<parallel>, #tpu.dimension_semantics<parallel>], iteration_bounds = array<i64: 2, 1>, scalar_prefetch = 0 : i64, scratch_operands = 0 : i64, tpu.core_type = #tpu.core_type<tc>, window_params = [{transform_indices = @transform_0, window_bounds = array<i64: 1, 8, 128>}, {pipeline_mode = #tpu.pipeline_mode<synchronous>, transform_indices = @transform_1, window_bounds = array<i64: 128, 32>}, {pipeline_mode = #tpu.pipeline_mode<synchronous>, transform_indices = @transform_2, window_bounds = array<i64: 1, 32>}, {pipeline_mode = #tpu.pipeline_mode<synchronous>, transform_indices = @transform_3, window_bounds = array<i64: 128, 32>}, {pipeline_mode = #tpu.pipeline_mode<synchronous>, transform_indices = @transform_4, window_bounds = array<i64: 1, 32>}, {pipeline_mode = #tpu.pipeline_mode<synchronous>, transform_indices = @transform_5, window_bounds = array<i64: 128, 32>}, {pipeline_mode = #tpu.pipeline_mode<synchronous>, transform_indices = @transform_6, window_bounds = array<i64: 1, 32>}, {pipeline_mode = #tpu.pipeline_mode<synchronous>, transform_indices = @transform_7, window_bounds = array<i64: 32, 128>}, {pipeline_mode = #tpu.pipeline_mode<synchronous>, transform_indices = @transform_8, window_bounds = array<i64: 1, 128>}, {pipeline_mode = #tpu.pipeline_mode<synchronous>, transform_indices = @transform_9, window_bounds = array<i64: 1, 128>}, {pipeline_mode = #tpu.pipeline_mode<synchronous>, transform_indices = @transform_10, window_bounds = array<i64: 1, 128>}, {pipeline_mode = #tpu.pipeline_mode<synchronous>, transform_indices = @transform_11, window_bounds = array<i64: 128, 128>}, {pipeline_mode = #tpu.pipeline_mode<synchronous>, transform_indices = @transform_12, window_bounds = array<i64: 1, 128>}, {pipeline_mode = #tpu.pipeline_mode<synchronous>, transform_indices = @transform_13, window_bounds = array<i64: 128, 128>}, {pipeline_mode = #tpu.pipeline_mode<synchronous>, transform_indices = @transform_14, window_bounds = array<i64: 1, 128>}, {pipeline_mode = #tpu.pipeline_mode<synchronous>, transform_indices = @transform_15, window_bounds = array<i64: 1, 128>}, {pipeline_mode = #tpu.pipeline_mode<synchronous>, transform_indices = @transform_16, window_bounds = array<i64: 1, 128>}, {transform_indices = @transform_17, window_bounds = array<i64: 1, 8, 128>}]} {
    %c8_i32 = arith.constant 8 : i32
    %0 = arith.muli %arg1, %c8_i32 : i32
    %1 = tpu.assume_multiple %0, 8 : i32
    %c0 = arith.constant 0 : index
    %c0_0 = arith.constant 0 : index
    %c0_1 = arith.constant 0 : index
    %2 = vector.load %arg2[%c0, %c0_0, %c0_1] : memref<1x8x128xf32, #tpu.memory_space<vmem>>, vector<1x8x128xf32>
    %3 = vector.shape_cast %2 : vector<1x8x128xf32> to vector<8x128xf32>
    %c0_2 = arith.constant 0 : index
    %4 = arith.index_cast %1 : i32 to index
    %c0_3 = arith.constant 0 : index
    %5 = vector.load %arg2[%c0_2, %4, %c0_3] : memref<1x8x128xf32, #tpu.memory_space<vmem>>, vector<1x8x128xf32>
    %6 = vector.shape_cast %5 : vector<1x8x128xf32> to vector<8x128xf32>
    %7 = arith.truncf %3 : vector<8x128xf32> to vector<8x128xbf16>
    %8 = arith.truncf %6 : vector<8x128xf32> to vector<8x128xbf16>
    %c0_4 = arith.constant 0 : index
    %c0_5 = arith.constant 0 : index
    %9 = vector.load %arg3[%c0_4, %c0_5] : memref<128x32xbf16, #tpu.memory_space<vmem>>, vector<128x32xbf16>
    %cst = arith.constant dense<0.000000e+00> : vector<8x32xf32>
    %10 = tpu.matmul %8, %9, %cst {dimension_numbers = #tpu.dot_dimension_numbers<[1], [0], [0], [1], [0, 0, 1, 1], [], []>} : vector<8x128xbf16>, vector<128x32xbf16>, vector<8x32xf32> -> vector<8x32xf32>
    %c0_6 = arith.constant 0 : index
    %c0_7 = arith.constant 0 : index
    %11 = vector.load %arg4[%c0_6, %c0_7] : memref<1x32xf32, #tpu.memory_space<vmem>>, vector<1x32xf32>
    %12 = vector.broadcast %11 : vector<1x32xf32> to vector<8x32xf32>
    %13 = arith.addf %10, %12 : vector<8x32xf32>
    %c0_8 = arith.constant 0 : index
    %c0_9 = arith.constant 0 : index
    %14 = vector.load %arg5[%c0_8, %c0_9] : memref<128x32xbf16, #tpu.memory_space<vmem>>, vector<128x32xbf16>
    %cst_10 = arith.constant dense<0.000000e+00> : vector<8x32xf32>
    %15 = tpu.matmul %7, %14, %cst_10 {dimension_numbers = #tpu.dot_dimension_numbers<[1], [0], [0], [1], [0, 0, 1, 1], [], []>} : vector<8x128xbf16>, vector<128x32xbf16>, vector<8x32xf32> -> vector<8x32xf32>
    %c0_11 = arith.constant 0 : index
    %c0_12 = arith.constant 0 : index
    %16 = vector.load %arg6[%c0_11, %c0_12] : memref<1x32xf32, #tpu.memory_space<vmem>>, vector<1x32xf32>
    %17 = vector.broadcast %16 : vector<1x32xf32> to vector<8x32xf32>
    %18 = arith.addf %15, %17 : vector<8x32xf32>
    %c0_13 = arith.constant 0 : index
    %c0_14 = arith.constant 0 : index
    %19 = vector.load %arg7[%c0_13, %c0_14] : memref<128x32xbf16, #tpu.memory_space<vmem>>, vector<128x32xbf16>
    %cst_15 = arith.constant dense<0.000000e+00> : vector<8x32xf32>
    %20 = tpu.matmul %7, %19, %cst_15 {dimension_numbers = #tpu.dot_dimension_numbers<[1], [0], [0], [1], [0, 0, 1, 1], [], []>} : vector<8x128xbf16>, vector<128x32xbf16>, vector<8x32xf32> -> vector<8x32xf32>
    %c0_16 = arith.constant 0 : index
    %c0_17 = arith.constant 0 : index
    %21 = vector.load %arg8[%c0_16, %c0_17] : memref<1x32xf32, #tpu.memory_space<vmem>>, vector<1x32xf32>
    %22 = vector.broadcast %21 : vector<1x32xf32> to vector<8x32xf32>
    %23 = arith.addf %20, %22 : vector<8x32xf32>
    %cst_18 = arith.constant 0.353553385 : f32
    %24 = vector.broadcast %cst_18 : f32 to vector<8x32xf32>
    %25 = arith.mulf %13, %24 : vector<8x32xf32>
    %26 = vector.shape_cast %25 : vector<8x32xf32> to vector<8x4x8xf32>
    %27 = tpu.transpose %26, [1, 0, 2] : vector<8x4x8xf32> -> vector<4x8x8xf32>
    %28 = arith.truncf %27 : vector<4x8x8xf32> to vector<4x8x8xbf16>
    %29 = vector.shape_cast %18 : vector<8x32xf32> to vector<8x4x8xf32>
    %30 = tpu.transpose %29, [1, 0, 2] : vector<8x4x8xf32> -> vector<4x8x8xf32>
    %31 = arith.truncf %30 : vector<4x8x8xf32> to vector<4x8x8xbf16>
    %32 = vector.shape_cast %23 : vector<8x32xf32> to vector<8x4x8xf32>
    %33 = tpu.transpose %32, [1, 0, 2] : vector<8x4x8xf32> -> vector<4x8x8xf32>
    %34 = arith.truncf %33 : vector<4x8x8xf32> to vector<4x8x8xbf16>
    "tpu.trace_start"() <{level = 10 : i32, message = "hqd,hkd->hqk"}> : () -> ()
    %cst_19 = arith.constant dense<0.000000e+00> : vector<4x8x8xf32>
    %35 = tpu.matmul %28, %31, %cst_19 {dimension_numbers = #tpu.dot_dimension_numbers<[2], [2], [1], [1], [0, 0, 0, 1, 1, 1], [0], [0]>} : vector<4x8x8xbf16>, vector<4x8x8xbf16>, vector<4x8x8xf32> -> vector<4x8x8xf32>
    "tpu.trace_stop"() : () -> ()
    %cst_20 = arith.constant dense<0xFF800000> : vector<4x8xf32>
    %36 = vector.multi_reduction <maximumf>, %35, %cst_20 [2] : vector<4x8x8xf32> to vector<4x8xf32>
    %37 = vector.shape_cast %36 : vector<4x8xf32> to vector<4x8x1xf32>
    %38 = vector.broadcast %37 : vector<4x8x1xf32> to vector<4x8x8xf32>
    %39 = arith.subf %35, %38 : vector<4x8x8xf32>
    %40 = math.exp %39 : vector<4x8x8xf32>
    %cst_21 = arith.constant dense<0.000000e+00> : vector<4x8xf32>
    %41 = vector.multi_reduction <add>, %40, %cst_21 [2] : vector<4x8x8xf32> to vector<4x8xf32>
    %42 = vector.shape_cast %41 : vector<4x8xf32> to vector<4x8x1xf32>
    %43 = arith.truncf %40 : vector<4x8x8xf32> to vector<4x8x8xbf16>
    "tpu.trace_start"() <{level = 10 : i32, message = "hqk,hkd->hqd"}> : () -> ()
    %cst_22 = arith.constant dense<0.000000e+00> : vector<4x8x8xf32>
    %44 = tpu.matmul %43, %34, %cst_22 {dimension_numbers = #tpu.dot_dimension_numbers<[2], [1], [1], [2], [0, 0, 0, 1, 1, 2], [0], [0]>} : vector<4x8x8xbf16>, vector<4x8x8xbf16>, vector<4x8x8xf32> -> vector<4x8x8xf32>
    "tpu.trace_stop"() : () -> ()
    %45 = tpu.reciprocal %42 {approx = true} : vector<4x8x1xf32> -> vector<4x8x1xf32>
    %46 = vector.broadcast %45 : vector<4x8x1xf32> to vector<4x8x8xf32>
    %47 = arith.mulf %44, %46 : vector<4x8x8xf32>
    %48 = tpu.transpose %47, [1, 0, 2] : vector<4x8x8xf32> -> vector<8x4x8xf32>
    %49 = vector.shape_cast %48 : vector<8x4x8xf32> to vector<8x32xf32>
    %50 = arith.truncf %49 : vector<8x32xf32> to vector<8x32xbf16>
    %c0_23 = arith.constant 0 : index
    %c0_24 = arith.constant 0 : index
    %51 = vector.load %arg9[%c0_23, %c0_24] : memref<32x128xbf16, #tpu.memory_space<vmem>>, vector<32x128xbf16>
    %cst_25 = arith.constant dense<0.000000e+00> : vector<8x128xf32>
    %52 = tpu.matmul %50, %51, %cst_25 {dimension_numbers = #tpu.dot_dimension_numbers<[1], [0], [0], [1], [0, 0, 1, 1], [], []>} : vector<8x32xbf16>, vector<32x128xbf16>, vector<8x128xf32> -> vector<8x128xf32>
    %c0_26 = arith.constant 0 : index
    %c0_27 = arith.constant 0 : index
    %53 = vector.load %arg10[%c0_26, %c0_27] : memref<1x128xf32, #tpu.memory_space<vmem>>, vector<1x128xf32>
    %54 = vector.broadcast %53 : vector<1x128xf32> to vector<8x128xf32>
    %55 = arith.addf %52, %54 : vector<8x128xf32>
    %56 = tpu.iota {dimensions = array<i32: 1>} : vector<1x128xi32>
    %c32_i32 = arith.constant 32 : i32
    %57 = vector.broadcast %c32_i32 : i32 to vector<1x128xi32>
    %58 = arith.cmpi slt, %56, %57 : vector<1x128xi32>
    %59 = arith.extui %58 : vector<1x128xi1> to vector<1x128xi32>
    %60 = arith.sitofp %59 : vector<1x128xi32> to vector<1x128xf32>
    %61 = arith.addf %6, %55 : vector<8x128xf32>
    %c0_28 = arith.constant 0 : index
    %c0_29 = arith.constant 0 : index
    %62 = vector.load %arg11[%c0_28, %c0_29] : memref<1x128xf32, #tpu.memory_space<vmem>>, vector<1x128xf32>
    %c0_30 = arith.constant 0 : index
    %c0_31 = arith.constant 0 : index
    %63 = vector.load %arg12[%c0_30, %c0_31] : memref<1x128xf32, #tpu.memory_space<vmem>>, vector<1x128xf32>
    %cst_32 = arith.constant dense<0.000000e+00> : vector<8xf32>
    %64 = vector.multi_reduction <add>, %61, %cst_32 [1] : vector<8x128xf32> to vector<8xf32>
    %65 = vector.shape_cast %64 : vector<8xf32> to vector<8x1xf32>
    %cst_33 = arith.constant 3.125000e-02 : f32
    %66 = vector.broadcast %cst_33 : f32 to vector<8x1xf32>
    %67 = arith.mulf %65, %66 : vector<8x1xf32>
    %68 = vector.broadcast %67 : vector<8x1xf32> to vector<8x128xf32>
    %69 = arith.subf %61, %68 : vector<8x128xf32>
    %70 = vector.broadcast %60 : vector<1x128xf32> to vector<8x128xf32>
    %71 = arith.mulf %69, %70 : vector<8x128xf32>
    %72 = arith.mulf %71, %71 : vector<8x128xf32>
    %cst_34 = arith.constant dense<0.000000e+00> : vector<8xf32>
    %73 = vector.multi_reduction <add>, %72, %cst_34 [1] : vector<8x128xf32> to vector<8xf32>
    %74 = vector.shape_cast %73 : vector<8xf32> to vector<8x1xf32>
    %cst_35 = arith.constant 3.125000e-02 : f32
    %75 = vector.broadcast %cst_35 : f32 to vector<8x1xf32>
    %76 = arith.mulf %74, %75 : vector<8x1xf32>
    %cst_36 = arith.constant 9.99999974E-6 : f32
    %77 = vector.broadcast %cst_36 : f32 to vector<8x1xf32>
    %78 = arith.addf %76, %77 : vector<8x1xf32>
    %79 = math.rsqrt %78 : vector<8x1xf32>
    %80 = vector.broadcast %79 : vector<8x1xf32> to vector<8x128xf32>
    %81 = arith.mulf %71, %80 : vector<8x128xf32>
    %82 = vector.broadcast %62 : vector<1x128xf32> to vector<8x128xf32>
    %83 = arith.mulf %81, %82 : vector<8x128xf32>
    %84 = vector.broadcast %63 : vector<1x128xf32> to vector<8x128xf32>
    %85 = arith.addf %83, %84 : vector<8x128xf32>
    %86 = arith.truncf %85 : vector<8x128xf32> to vector<8x128xbf16>
    %c0_37 = arith.constant 0 : index
    %c0_38 = arith.constant 0 : index
    %87 = vector.load %arg13[%c0_37, %c0_38] : memref<128x128xbf16, #tpu.memory_space<vmem>>, vector<128x128xbf16>
    %cst_39 = arith.constant dense<0.000000e+00> : vector<8x128xf32>
    %88 = tpu.matmul %86, %87, %cst_39 {dimension_numbers = #tpu.dot_dimension_numbers<[1], [0], [0], [1], [0, 0, 1, 1], [], []>} : vector<8x128xbf16>, vector<128x128xbf16>, vector<8x128xf32> -> vector<8x128xf32>
    %c0_40 = arith.constant 0 : index
    %c0_41 = arith.constant 0 : index
    %89 = vector.load %arg14[%c0_40, %c0_41] : memref<1x128xf32, #tpu.memory_space<vmem>>, vector<1x128xf32>
    %90 = vector.broadcast %89 : vector<1x128xf32> to vector<8x128xf32>
    %91 = arith.addf %88, %90 : vector<8x128xf32>
    %cst_42 = arith.constant 0.000000e+00 : f32
    %92 = vector.broadcast %cst_42 : f32 to vector<8x128xf32>
    %93 = arith.maximumf %91, %92 : vector<8x128xf32>
    %94 = arith.truncf %93 : vector<8x128xf32> to vector<8x128xbf16>
    %c0_43 = arith.constant 0 : index
    %c0_44 = arith.constant 0 : index
    %95 = vector.load %arg15[%c0_43, %c0_44] : memref<128x128xbf16, #tpu.memory_space<vmem>>, vector<128x128xbf16>
    %cst_45 = arith.constant dense<0.000000e+00> : vector<8x128xf32>
    %96 = tpu.matmul %94, %95, %cst_45 {dimension_numbers = #tpu.dot_dimension_numbers<[1], [0], [0], [1], [0, 0, 1, 1], [], []>} : vector<8x128xbf16>, vector<128x128xbf16>, vector<8x128xf32> -> vector<8x128xf32>
    %c0_46 = arith.constant 0 : index
    %c0_47 = arith.constant 0 : index
    %97 = vector.load %arg16[%c0_46, %c0_47] : memref<1x128xf32, #tpu.memory_space<vmem>>, vector<1x128xf32>
    %98 = vector.broadcast %97 : vector<1x128xf32> to vector<8x128xf32>
    %99 = arith.addf %96, %98 : vector<8x128xf32>
    %100 = arith.addf %85, %99 : vector<8x128xf32>
    %c0_48 = arith.constant 0 : index
    %c0_49 = arith.constant 0 : index
    %101 = vector.load %arg17[%c0_48, %c0_49] : memref<1x128xf32, #tpu.memory_space<vmem>>, vector<1x128xf32>
    %c0_50 = arith.constant 0 : index
    %c0_51 = arith.constant 0 : index
    %102 = vector.load %arg18[%c0_50, %c0_51] : memref<1x128xf32, #tpu.memory_space<vmem>>, vector<1x128xf32>
    %cst_52 = arith.constant dense<0.000000e+00> : vector<8xf32>
    %103 = vector.multi_reduction <add>, %100, %cst_52 [1] : vector<8x128xf32> to vector<8xf32>
    %104 = vector.shape_cast %103 : vector<8xf32> to vector<8x1xf32>
    %cst_53 = arith.constant 3.125000e-02 : f32
    %105 = vector.broadcast %cst_53 : f32 to vector<8x1xf32>
    %106 = arith.mulf %104, %105 : vector<8x1xf32>
    %107 = vector.broadcast %106 : vector<8x1xf32> to vector<8x128xf32>
    %108 = arith.subf %100, %107 : vector<8x128xf32>
    %109 = vector.broadcast %60 : vector<1x128xf32> to vector<8x128xf32>
    %110 = arith.mulf %108, %109 : vector<8x128xf32>
    %111 = arith.mulf %110, %110 : vector<8x128xf32>
    %cst_54 = arith.constant dense<0.000000e+00> : vector<8xf32>
    %112 = vector.multi_reduction <add>, %111, %cst_54 [1] : vector<8x128xf32> to vector<8xf32>
    %113 = vector.shape_cast %112 : vector<8xf32> to vector<8x1xf32>
    %cst_55 = arith.constant 3.125000e-02 : f32
    %114 = vector.broadcast %cst_55 : f32 to vector<8x1xf32>
    %115 = arith.mulf %113, %114 : vector<8x1xf32>
    %cst_56 = arith.constant 9.99999974E-6 : f32
    %116 = vector.broadcast %cst_56 : f32 to vector<8x1xf32>
    %117 = arith.addf %115, %116 : vector<8x1xf32>
    %118 = math.rsqrt %117 : vector<8x1xf32>
    %119 = vector.broadcast %118 : vector<8x1xf32> to vector<8x128xf32>
    %120 = arith.mulf %110, %119 : vector<8x128xf32>
    %121 = vector.broadcast %101 : vector<1x128xf32> to vector<8x128xf32>
    %122 = arith.mulf %120, %121 : vector<8x128xf32>
    %123 = vector.broadcast %102 : vector<1x128xf32> to vector<8x128xf32>
    %124 = arith.addf %122, %123 : vector<8x128xf32>
    %c0_57 = arith.constant 0 : index
    %c0_58 = arith.constant 0 : index
    %c0_59 = arith.constant 0 : index
    %125 = vector.load %arg19[%c0_57, %c0_58, %c0_59] : memref<1x8x128xf32, #tpu.memory_space<vmem>>, vector<1x8x128xf32>
    %126 = vector.shape_cast %125 : vector<1x8x128xf32> to vector<8x128xf32>
    %127 = vector.shape_cast %124 : vector<8x128xf32> to vector<1x8x128xf32>
    tpu.vector_store %arg19[%c0_57, %c0_58, %c0_59], %127 {strides = array<i32>} : memref<1x8x128xf32, #tpu.memory_space<vmem>>, vector<1x8x128xf32>,
    return
  }
  func.func @transform_0(%arg0: i32, %arg1: i32) -> (i32, i32, i32) {
    %c0_i32 = arith.constant 0 : i32
    %c0_i32_0 = arith.constant 0 : i32
    %c0_i32_1 = arith.constant 0 : i32
    return %arg0, %c0_i32, %c0_i32_0 : i32, i32, i32
  }
  func.func @transform_1(%arg0: i32, %arg1: i32) -> (i32, i32) {
    %c0_i32 = arith.constant 0 : i32
    %c0_i32_0 = arith.constant 0 : i32
    %c0_i32_1 = arith.constant 0 : i32
    return %c0_i32, %c0_i32_0 : i32, i32
  }
  func.func @transform_2(%arg0: i32, %arg1: i32) -> (i32, i32) {
    %c0_i32 = arith.constant 0 : i32
    %c0_i32_0 = arith.constant 0 : i32
    %c0_i32_1 = arith.constant 0 : i32
    return %c0_i32, %c0_i32_0 : i32, i32
  }
  func.func @transform_3(%arg0: i32, %arg1: i32) -> (i32, i32) {
    %c0_i32 = arith.constant 0 : i32
    %c0_i32_0 = arith.constant 0 : i32
    %c0_i32_1 = arith.constant 0 : i32
    return %c0_i32, %c0_i32_0 : i32, i32
  }
  func.func @transform_4(%arg0: i32, %arg1: i32) -> (i32, i32) {
    %c0_i32 = arith.constant 0 : i32
    %c0_i32_0 = arith.constant 0 : i32
    %c0_i32_1 = arith.constant 0 : i32
    return %c0_i32, %c0_i32_0 : i32, i32
  }
  func.func @transform_5(%arg0: i32, %arg1: i32) -> (i32, i32) {
    %c0_i32 = arith.constant 0 : i32
    %c0_i32_0 = arith.constant 0 : i32
    %c0_i32_1 = arith.constant 0 : i32
    return %c0_i32, %c0_i32_0 : i32, i32
  }
  func.func @transform_6(%arg0: i32, %arg1: i32) -> (i32, i32) {
    %c0_i32 = arith.constant 0 : i32
    %c0_i32_0 = arith.constant 0 : i32
    %c0_i32_1 = arith.constant 0 : i32
    return %c0_i32, %c0_i32_0 : i32, i32
  }
  func.func @transform_7(%arg0: i32, %arg1: i32) -> (i32, i32) {
    %c0_i32 = arith.constant 0 : i32
    %c0_i32_0 = arith.constant 0 : i32
    %c0_i32_1 = arith.constant 0 : i32
    return %c0_i32, %c0_i32_0 : i32, i32
  }
  func.func @transform_8(%arg0: i32, %arg1: i32) -> (i32, i32) {
    %c0_i32 = arith.constant 0 : i32
    %c0_i32_0 = arith.constant 0 : i32
    %c0_i32_1 = arith.constant 0 : i32
    return %c0_i32, %c0_i32_0 : i32, i32
  }
  func.func @transform_9(%arg0: i32, %arg1: i32) -> (i32, i32) {
    %c0_i32 = arith.constant 0 : i32
    %c0_i32_0 = arith.constant 0 : i32
    %c0_i32_1 = arith.constant 0 : i32
    return %c0_i32, %c0_i32_0 : i32, i32
  }
  func.func @transform_10(%arg0: i32, %arg1: i32) -> (i32, i32) {
    %c0_i32 = arith.constant 0 : i32
    %c0_i32_0 = arith.constant 0 : i32
    %c0_i32_1 = arith.constant 0 : i32
    return %c0_i32, %c0_i32_0 : i32, i32
  }
  func.func @transform_11(%arg0: i32, %arg1: i32) -> (i32, i32) {
    %c0_i32 = arith.constant 0 : i32
    %c0_i32_0 = arith.constant 0 : i32
    %c0_i32_1 = arith.constant 0 : i32
    return %c0_i32, %c0_i32_0 : i32, i32
  }
  func.func @transform_12(%arg0: i32, %arg1: i32) -> (i32, i32) {
    %c0_i32 = arith.constant 0 : i32
    %c0_i32_0 = arith.constant 0 : i32
    %c0_i32_1 = arith.constant 0 : i32
    return %c0_i32, %c0_i32_0 : i32, i32
  }
  func.func @transform_13(%arg0: i32, %arg1: i32) -> (i32, i32) {
    %c0_i32 = arith.constant 0 : i32
    %c0_i32_0 = arith.constant 0 : i32
    %c0_i32_1 = arith.constant 0 : i32
    return %c0_i32, %c0_i32_0 : i32, i32
  }
  func.func @transform_14(%arg0: i32, %arg1: i32) -> (i32, i32) {
    %c0_i32 = arith.constant 0 : i32
    %c0_i32_0 = arith.constant 0 : i32
    %c0_i32_1 = arith.constant 0 : i32
    return %c0_i32, %c0_i32_0 : i32, i32
  }
  func.func @transform_15(%arg0: i32, %arg1: i32) -> (i32, i32) {
    %c0_i32 = arith.constant 0 : i32
    %c0_i32_0 = arith.constant 0 : i32
    %c0_i32_1 = arith.constant 0 : i32
    return %c0_i32, %c0_i32_0 : i32, i32
  }
  func.func @transform_16(%arg0: i32, %arg1: i32) -> (i32, i32) {
    %c0_i32 = arith.constant 0 : i32
    %c0_i32_0 = arith.constant 0 : i32
    %c0_i32_1 = arith.constant 0 : i32
    return %c0_i32, %c0_i32_0 : i32, i32
  }
  func.func @transform_17(%arg0: i32, %arg1: i32) -> (i32, i32, i32) {
    %c0_i32 = arith.constant 0 : i32
    %c0_i32_0 = arith.constant 0 : i32
    return %arg0, %arg1, %c0_i32 : i32, i32, i32
  }
}

</mosaic_0001>

<bundles_post_ra>
// kernel: tpu_custom_call.1
= control target key start
LH: loop header
LB: loop body
LE: loop exit
PB: predicated region body
PF: predicated region fallthrough
CT: control target
= control target key end

     0   :  { %s3428_s0 = inlined_call_operand.vmem [shape: f32[2,8,128], index: 0, kind: input, shape index: {}]   ;;  %s3429_s1 = inlined_call_operand.vmem [shape: bf16[128,32], index: 1, kind: input, shape index: {}]   ;;  %s3430_s2 = inlined_call_operand.vmem [shape: f32[1,32], index: 2, kind: input, shape index: {}]   ;;  %s3431_s3 = inlined_call_operand.vmem [shape: bf16[128,32], index: 3, kind: input, shape index: {}]   ;;  %s3432_s4 = inlined_call_operand.vmem [shape: f32[1,32], index: 4, kind: input, shape index: {}]   ;;  %s3433_s5 = inlined_call_operand.vmem [shape: bf16[128,32], index: 5, kind: input, shape index: {}]   ;;  %s3434_s6 = inlined_call_operand.vmem [shape: f32[1,32], index: 6, kind: input, shape index: {}]   ;;  %s3435_s7 = inlined_call_operand.vmem [shape: bf16[32,128], index: 7, kind: input, shape index: {}]   ;;  %s3436_s8 = inlined_call_operand.vmem [shape: f32[1,128], index: 8, kind: input, shape index: {}]   ;;  %s3437_s9 = inlined_call_operand.vmem [shape: f32[1,128], index: 9, kind: input, shape index: {}]   ;;  %s3438_s10 = inlined_call_operand.vmem [shape: f32[1,128], index: 10, kind: input, shape index: {}]   ;;  %s3439_s11 = inlined_call_operand.vmem [shape: bf16[128,128], index: 11, kind: input, shape index: {}]   ;;  %s3440_s12 = inlined_call_operand.vmem [shape: f32[1,128], index: 12, kind: input, shape index: {}]   ;;  %s3441_s13 = inlined_call_operand.vmem [shape: bf16[128,128], index: 13, kind: input, shape index: {}]   ;;  %s3442_s14 = inlined_call_operand.vmem [shape: f32[1,128], index: 14, kind: input, shape index: {}]   ;;  %s3443_s15 = inlined_call_operand.vmem [shape: f32[1,128], index: 15, kind: input, shape index: {}]   ;;  %s3444_s16 = inlined_call_operand.vmem [shape: f32[1,128], index: 16, kind: input, shape index: {}]   ;;  %s3445_s17 = inlined_call_operand.hbm [shape: f32[2,8,128], index: 17, kind: output, shape index: {}]  }
   0x1   :  { %3454 = sst [smem:[#allocation12_spill]] %s3428_s0 }
   0x2   :  { %3455 = sst [smem:[#allocation13_spill]] %s3429_s1 }
   0x3   :  { %3456 = sst [smem:[#allocation14_spill]] %s3430_s2 }
   0x4   :  { %3457 = sst [smem:[#allocation15_spill]] %s3431_s3 }
   0x5   :  { %3458 = sst [smem:[#allocation16_spill]] %s3432_s4 }
   0x6   :  { %22 = vsyncpa [#allocation3], 0 }
   0x7   :  { %24 = vsyncpa [#allocation3 + $0x1], 0  ;;  %s2969_s24 = smov 0   ;;  %s2971_s25 = smov 0  }
   0x8   :  { %s2973_s26 = smov 0   ;;  %s2975_s27 = smov 0  }
   0x9   :  { %s2977_s28 = smov 0   ;;  %s2979_s29 = smov 0  }
   0xa LB: > { %3459 = sst [smem:[#allocation5_spill]] %s2846_s24  ;;  %s2362_s0 = sadd.s32 4294967295, %s2866_s29   ;;  %s2866_s29 = sphi %s2979_s29, %s30_s29   ;;  %s2862_s28 = sphi %s2977_s28, %s3479_s28   ;;  %s2858_s27 = sphi %s2975_s27, %s3482_s27   ;;  %s2854_s26 = sphi %s2973_s26, %s3477_s26   ;;  %s2850_s25 = sphi %s2971_s25, %s3481_s25   ;;  %s2846_s24 = sphi %s2969_s24, %s3480_s24  }
   0xb   : > { %3460 = sst [smem:[#allocation6_spill]] %s2854_s26  ;;  %s2363_s30 = sadd.s32 4294967294, %s2866_s29  }
   0xc   : > { %3461 = sst [smem:[#allocation7_spill]] %s2862_s28  ;;  %s42_s18 = sadd.s32 1, %s2862_s28 }
   0xd   : > { %3462 = sst [smem:[#allocation8_spill]] %s2866_s29  ;;  %s413_s19 = sadd.s32 1, %s2854_s26 }
   0xe   : > { %p44_p0 = scmp.ge.s32.totalorder %s42_s18, 2  ;;  %p423_p1 = scmp.ne.s32.totalorder %s2854_s26, %s2850_s25 }
   0xf   : > { %p424_p2 = scmp.eq.s32.totalorder %s2362_s0, 1  ;;  %p429_p3 = scmp.ne.s32.totalorder %s2850_s25, %s2846_s24 }
  0x10   : > { %s3484_s18 = smov (%p44_p0, %s42_s18), 0  ;;  %p430_p5 = scmp.eq.s32.totalorder %s2363_s30, 1 }
  0x11   : > { %3463 = sst [smem:[#allocation9_spill]] %s3484_s18  ;;  %p3009_p4 = por %p424_p2, %p423_p1 }
  0x12   : > { %s408_s20 = ssub.s32 %s2862_s28, %s3484_s18  ;;  %p2366_p6 = scmp.ge.s32.totalorder %s2866_s29, 1 }
  0x13   : > { %p411_p7 = scmp.eq.s32.totalorder %s408_s20, 0  ;;  %p3016_p8 = por %p430_p5, %p429_p3 }
  0x14   : > { %p503_p9 = scmp.lt.s32.totalorder %s2866_s29, 3 }
  0x15   : > { %s3465_s21 = scalar_select %p3016_p8, 1, 0 }
  0x16   : > { %s3022_s22 = scalar_select %p411_p7, %s2854_s26, %s413_s19  }
  0x17   : > { %3466 = sst [smem:[#allocation10_spill]] %s3465_s21  ;;  %p504_p10 = pnand %p2366_p6, %p503_p9 }
  0x18   : > { %3467 = sst [smem:[#allocation11_spill]] %s3022_s22  ;;  %p554_p11 = scmp.lt.s32.totalorder (!%p504_p10), %s2858_s27, 1 }
  0x19   : > { %507 = sbr.rel (%p504_p10) target bundleno = 2377 (0x949), region = 88  ;;  %s3468_s3 = sld [smem:[#allocation15_spill]] (!%p504_p10) }
  0x1a   : > { %s3469_s18 = sld [smem:[#allocation13_spill]] (!%p504_p10)  ;;  %s2870_s20 = smov (!%p504_p10), 104  }
  0x1b   : > { %s3470_s28 = sld [smem:[#allocation12_spill]] (!%p504_p10)  ;;  %s2871_s19 = smov (!%p504_p10), 120  }
  0x1c   : > { %s3471_s4 = sld [smem:[#allocation16_spill]] (!%p504_p10)  ;;  %s2875_s24 = smov (!%p504_p10), 16  }
  0x1d   : > { %s3472_s2 = sld [smem:[#allocation14_spill]] (!%p504_p10)  ;;  %s2876_s21 = smov (!%p504_p10), 8  }
  0x1e   : > { %v2868_v1 = vmov 0.0   ;;  %vm2869_vm0 = vmmov 0   ;;  %s555_s22 = scalar_select %p554_p11, %s2858_s27, 1  ;;  %v2744_v19 = vld [vmem:[%s3433_s5 + $0x38] sm:$0xff]   ;;  %v2745_v20 = vld [vmem:[%s3433_s5 + $0x30] sm:$0xff]   ;;  %v2746_v21 = vld [vmem:[%s3433_s5 + $0x28] sm:$0xff]   ;;  %v914_v46 = vlaneseq }
  0x1f   : > { %v2728_v0 = vld [vmem:[%s3468_s3 + $0x38] sm:$0xff]   ;;  %2527 = vmatprep.subr.bf16.mxu1 %v2868_v1  ;;  %2507 = vmatprep.subr.bf16.mxu0 %v2868_v1  ;;  %v2730_v3 = vld [vmem:[%s3468_s3 + $0x30] sm:$0xff]   ;;  %v2732_v5 = vld [vmem:[%s3468_s3 + $0x28] sm:$0xff]   ;;  %v2873_v44 = vmov 1983009808   ;;  %vm1349_vm1 = vcmask 64512  }
  0x20   : > { %v2729_v2 = vld [vmem:[%s3469_s18 + $0x38] sm:$0xff]   ;;  %2528 = vmatpush3.bf16.msra.mxu1 %v2728_v0  ;;  %2543 = vmatprep.mubr.msk.bf16.mxu1 %vm2869_vm0, %v2868_v1  ;;  %v2731_v4 = vld [vmem:[%s3469_s18 + $0x30] sm:$0xff]   ;;  %v2733_v6 = vld [vmem:[%s3469_s18 + $0x28] sm:$0xff]   ;;  %s2368_s30 = sshll.u32 %s555_s22, 3  ;;  %v912_v45 = vunpack.c.l.s4 %v2873_v44  ;;  %v2874_v49 = vmov 1934713408  }
  0x21   : > { %2508 = vmatpush3.bf16.msra.mxu0 %v2729_v2  ;;  %2529 = vmatprep.subr.bf16.mxu1 %v2868_v1  ;;  %v2734_v7 = vld [vmem:[%s3468_s3 + $0x20] sm:$0xff]   ;;  %v2736_v9 = vld [vmem:[%s3468_s3 + $0x18] sm:$0xff]   ;;  %v2738_v11 = vld [vmem:[%s3468_s3 + $0x10] sm:$0xff]   ;;  %s557_s29 = scalar_lea.vmem %s3470_s28, %s2368_s30  ;;  %v944_v50 = vunpack.c.l.s4 %v2874_v49  ;;  %v915_v52 = vshrl.u32 %v914_v46, 7  ;;  %vm1577_vm2 = vcmask 1043456   ;;  %vm1916_vm3 = vcmask 130048  }
  0x22   : > { %2509 = vmatprep.subr.bf16.mxu0 %v2868_v1  ;;  %2523 = vmatprep.mubr.msk.bf16.mxu0 %vm2869_vm0, %v2868_v1  ;;  %v2735_v8 = vld [vmem:[%s3469_s18 + $0x20] sm:$0xff]   ;;  %v2737_v10 = vld [vmem:[%s3469_s18 + $0x18] sm:$0xff]   ;;  %v2739_v12 = vld [vmem:[%s3469_s18 + $0x10] sm:$0xff]   ;;  %v913_v51 = vunpack.c.0.s8 %v912_v45  ;;  %vm1918_vm4 = vcmask 195584   ;;  %vm1944_vm5 = vcmask 261120   ;;  %s2440_s0 = sshll.u32 %s2858_s27, 7 }
  0x23   : > { %v2740_v13 = vld [vmem:[%s3468_s3 + $0x8] sm:$0xff]   ;;  %v2742_v15 = vld [vmem:[%s3468_s3] sm:$0xff]   ;;  %v2748_v23 = vld [vmem:[%s3433_s5 + $0x18] sm:$0xff]   ;;  %v945_v55 = vunpack.c.0.s8 %v944_v50 }
  0x24   : > { %2530 = vmatpush3.bf16.msra.mxu1 %v2730_v3  ;;  %v2741_v14 = vld [vmem:[%s3469_s18 + $0x8] sm:$0xff]   ;;  %v3092_v16 = vld [vmem:[%s557_s29] sm:$0xff]  ;;  %v2749_v24 = vld [vmem:[%s3433_s5 + $0x10] sm:$0xff]   ;;  %s2872_s29 = smov 112   ;;  %v3158_v56 = vsub.s32 %v913_v51, %v915_v52 }
  0x25   : > { %2510 = vmatpush3.bf16.msra.mxu0 %v2731_v4  ;;  %2531 = vmatprep.subr.bf16.mxu1 %v2868_v1  ;;  %v2743_v17 = vld [vmem:[%s3469_s18] sm:$0xff]   ;;  %v563_v18 = vpack.c.bf16 %v3092_v16, %v3092_v16  ;;  %v2750_v25 = vld [vmem:[%s3433_s5 + $0x8] sm:$0xff]   ;;  %v3160_v63 = vsub.s32 %v945_v55, %v915_v52 }
  0x26   : > { %2511 = vmatprep.subr.bf16.mxu0 %v2868_v1  ;;  %v2747_v22 = vld [vmem:[%s3433_s5 + $0x20] sm:$0xff]  }
  0x27   : > { %v2751_v26 = vld [vmem:[%s3433_s5] sm:$0xff]  }
  0x28   : > { %2532 = vmatpush3.bf16.msra.mxu1 %v2732_v5  ;;  %v2378_v27 = vld [vmem:[%s3471_s4] ss:$0 sm:$0xff] }
  0x29   : > { %2512 = vmatpush3.bf16.msra.mxu0 %v2733_v6  ;;  %2533 = vmatprep.subr.bf16.mxu1 %v2868_v1  ;;  %v2369_v28 = vld [vmem:[%s3472_s2] ss:$0 sm:$0xff]  ;;  %s2290_s2 = scalar_lea.hbm %s3445_s17, %s2440_s0 }
  0x2a   : > { %2513 = vmatprep.subr.bf16.mxu0 %v2868_v1  ;;  %v2387_v40 = vld [vmem:[%s3434_s6] ss:$0 sm:$0xff] }
  0x2c   : > { %2534 = vmatpush3.bf16.msra.mxu1 %v2734_v7 }
  0x2d   : > { %2514 = vmatpush3.bf16.msra.mxu0 %v2735_v8  ;;  %2535 = vmatprep.subr.bf16.mxu1 %v2868_v1 }
  0x2e   : > { %2515 = vmatprep.subr.bf16.mxu0 %v2868_v1 }
  0x30   : > { %2536 = vmatpush3.bf16.msra.mxu1 %v2736_v9 }
  0x31   : > { %2516 = vmatpush3.bf16.msra.mxu0 %v2737_v10  ;;  %2537 = vmatprep.subr.bf16.mxu1 %v2868_v1 }
  0x32   : > { %2517 = vmatprep.subr.bf16.mxu0 %v2868_v1 }
  0x34   : > { %2538 = vmatpush3.bf16.msra.mxu1 %v2738_v11 }
  0x35   : > { %2518 = vmatpush3.bf16.msra.mxu0 %v2739_v12  ;;  %2539 = vmatprep.subr.bf16.mxu1 %v2868_v1 }
  0x36   : > { %2519 = vmatprep.subr.bf16.mxu0 %v2868_v1 }
  0x38   : > { %2540 = vmatpush3.bf16.msra.mxu1 %v2740_v13 }
  0x39   : > { %2520 = vmatpush3.bf16.msra.mxu0 %v2741_v14  ;;  %2541 = vmatprep.subr.bf16.mxu1 %v2868_v1 }
  0x3a   : > { %2521 = vmatprep.subr.bf16.mxu0 %v2868_v1 }
  0x3c   : > { %2542 = vmatpush3.bf16.msra.mxu1 %v2742_v15 }
  0x3d   : > { %2522 = vmatpush3.bf16.msra.mxu0 %v2743_v17  ;;  %2567 = vmatprep.subr.bf16.mxu1 %v2868_v1 }
  0x3e   : > { %2547 = vmatprep.subr.bf16.mxu0 %v2868_v1 }
  0x3f   : > { %2544 = vmatmul.mubr.bf16.vlgmr.msra.gmra.mxu1 %v563_v18 }
  0x40   : > { %2524 = vmatmul.mubr.bf16.vlgmr.msra.gmra.mxu0 %v563_v18  ;;  %2569 = vmatprep.mubr.msk.bf16.mxu1 %vm2869_vm0, %v2868_v1 }
  0x41   : > { %2563 = vmatprep.mubr.msk.bf16.mxu0 %vm2869_vm0, %v2868_v1  ;;  %2548 = vmatpush3.bf16.msra.mxu0 %v2744_v19 }
  0x42   : > { %2549 = vmatprep.subr.bf16.mxu0 %v2868_v1 }
  0x45   : > { %2550 = vmatpush3.bf16.msra.mxu0 %v2745_v20 }
  0x46   : > { %2551 = vmatprep.subr.bf16.mxu0 %v2868_v1 }
  0x49   : > { %2552 = vmatpush3.bf16.msra.mxu0 %v2746_v21 }
  0x4a   : > { %2553 = vmatprep.subr.bf16.mxu0 %v2868_v1 }
  0x4d   : > { %2554 = vmatpush3.bf16.msra.mxu0 %v2747_v22 }
  0x4e   : > { %2555 = vmatprep.subr.bf16.mxu0 %v2868_v1 }
  0x51   : > { %2556 = vmatpush3.bf16.msra.mxu0 %v2748_v23 }
  0x52   : > { %2557 = vmatprep.subr.bf16.mxu0 %v2868_v1 }
  0x55   : > { %2558 = vmatpush3.bf16.msra.mxu0 %v2749_v24 }
  0x56   : > { %2559 = vmatprep.subr.bf16.mxu0 %v2868_v1 }
  0x59   : > { %2560 = vmatpush3.bf16.msra.mxu0 %v2750_v25 }
  0x5a   : > { %2561 = vmatprep.subr.bf16.mxu0 %v2868_v1 }
  0x5d   : > { %2562 = vmatpush3.bf16.msra.mxu0 %v2751_v26 }
  0x5e   : > { %2591 = vmatprep.subr.bf16.mxu0 %v2868_v1 }
  0x60   : > { %2564 = vmatmul.mubr.bf16.vlgmr.msra.gmra.mxu0 %v563_v18 }
  0x61   : > { %2593 = vmatprep.mubr.msk.bf16.mxu0 %vm2869_vm0, %v2868_v1 }
  0xff   : > { %v781_v29 = vpop.f32.mrf.mxu1 }
 0x100   : > { %v782_v30 = vadd.f32 %v2378_v27, %v781_v29  ;;  %v670_v31 = vpop.f32.mrf.mxu0 }
 0x101   : > { %v671_v32 = vadd.f32 %v2369_v28, %v670_v31  ;;  %v2545_v33 = vpop.f32.mrf.mxu1 }
 0x102   : > { %v2525_v34 = vpop.f32.mrf.mxu0  ;;  %1056 = vrot.lane.b32.xlu1 %v782_v30, %s2870_s20  ;;  %1050 = vrot.lane.b32.xlu0 %v782_v30, %s2871_s19 }
 0x103   : > { %v898_v35 = vmul.f32 0.35355338, %v671_v32  ;;  %v784_v36 = vpop.f32.mrf.mxu1 }
 0x104   : > { %v673_v37 = vpop.f32.mrf.mxu0 }
 0x105   : > { %v2546_v38 = vpop.f32.mrf.mxu1 }
 0x106   : > { %v2526_v39 = vpop.f32.mrf.mxu0  ;;  %900 = vrot.lane.b32.xlu1 %v898_v35, %s2871_s19  ;;  %1053 = vrot.lane.b32.xlu0 %v782_v30, %s2872_s29 }
 0x10a   : > { %906 = vrot.lane.b32.xlu1 %v898_v35, %s2870_s20  ;;  %903 = vrot.lane.b32.xlu0 %v898_v35, %s2872_s29 }
 0x120   : > { %v892_v41 = vpop.f32.mrf.mxu0 }
 0x121   : > { %v3154_v42 = vadd.f32 %v2387_v40, %v892_v41 }
 0x122   : > { %v2565_v43 = vpop.f32.mrf.mxu0 }
 0x123   : > { %1200 = vrot.lane.b32.xlu0 %v3154_v42, %s2871_s19  ;;  %s2878_s19 = smov [#allocation2]  }
 0x124   : > { %v895_v47 = vpop.f32.mrf.mxu0 }
 0x126   : > { %v2566_v48 = vpop.f32.mrf.mxu0 }
 0x174   : > { %v1057_v53 = vpop.permute.xlu1 %1056  ;;  %v1051_v54 = vpop.permute.xlu0 %1050 }
 0x175   : > { %v1075_v57 = vcombine.low %v1051_v54, %v1057_v53  ;;  %v1076_v58 = vcombine.high %v1051_v54, %v1057_v53 }
 0x177   : > { %v1083_v0 = vrot.slane %v1075_v57, %v3158_v56  ;;  %v1090_v2 = vrot.slane %v1076_v58, %v3158_v56 }
 0x178   : > { %v901_v59 = vpop.permute.xlu1 %900  ;;  %v1054_v60 = vpop.permute.xlu0 %1053 }
 0x179   : > { %v1059_v61 = vcombine.low %v782_v30, %v1054_v60  ;;  %v1060_v62 = vcombine.high %v782_v30, %v1054_v60 }
 0x17b   : > { %v1067_v3 = vrot.slane %v1059_v61, %v3158_v56  ;;  %v1074_v4 = vrot.slane %v1060_v62, %v3158_v56 }
 0x17c   : > { %v907_v5 = vpop.permute.xlu1 %906  ;;  %v904_v6 = vpop.permute.xlu0 %903 }
 0x17d   : > { %v1091_v7 = vcombine.low %v1067_v3, %v1083_v0  ;;  %v1092_v8 = vcombine.high %v1067_v3, %v1083_v0  ;;  %v1107_v9 = vcombine.low %v1074_v4, %v1090_v2  ;;  %v1108_v10 = vcombine.high %v1074_v4, %v1090_v2 }
 0x17e   : > { %v925_v11 = vcombine.low %v901_v59, %v907_v5  ;;  %v926_v12 = vcombine.high %v901_v59, %v907_v5  ;;  %v909_v13 = vcombine.low %v898_v35, %v904_v6  ;;  %v910_v14 = vcombine.high %v898_v35, %v904_v6 }
 0x17f   : > { %v1099_v15 = vrot.slane %v1091_v7, %v3160_v63  ;;  %v1106_v17 = vrot.slane %v1092_v8, %v3160_v63  ;;  %v1115_v18 = vrot.slane %v1107_v9, %v3160_v63  ;;  %v1122_v19 = vrot.slane %v1108_v10, %v3160_v63 }
 0x180   : > { %v933_v20 = vrot.slane %v925_v11, %v3158_v56  ;;  %v940_v21 = vrot.slane %v926_v12, %v3158_v56  ;;  %v917_v22 = vrot.slane %v909_v13, %v3158_v56  ;;  %v924_v23 = vrot.slane %v910_v14, %v3158_v56 }
 0x181   : > { %v1127_v24 = vcombine.low %v1099_v15, %v1106_v17  ;;  %v2398_v25 = vcombine.high %v1099_v15, %v1106_v17  ;;  %v1143_v26 = vcombine.low %v1115_v18, %v1122_v19  ;;  %v2399_v27 = vcombine.high %v1115_v18, %v1122_v19 }
 0x182   : > { %v941_v28 = vcombine.low %v917_v22, %v933_v20  ;;  %v942_v29 = vcombine.high %v917_v22, %v933_v20  ;;  %v957_v30 = vcombine.low %v924_v23, %v940_v21  ;;  %v958_v31 = vcombine.high %v924_v23, %v940_v21 }
 0x183   : > { %v1134_v32 = vrot.slane %v1127_v24, %v3158_v56  ;;  %v1142_v33 = vrot.slane %v2398_v25, %v3158_v56  ;;  %v1150_v34 = vrot.slane %v1143_v26, %v3158_v56  ;;  %v1158_v35 = vrot.slane %v2399_v27, %v3158_v56 }
 0x184   : > { %v949_v36 = vrot.slane %v941_v28, %v3160_v63  ;;  %v956_v37 = vrot.slane %v942_v29, %v3160_v63  ;;  %v965_v38 = vrot.slane %v957_v30, %v3160_v63  ;;  %v972_v39 = vrot.slane %v958_v31, %v3160_v63 }
 0x185   : > { %v1159_v40 = vcombine.low %v1134_v32, %v1142_v33  ;;  %v1175_v41 = vcombine.low %v1150_v34, %v1158_v35  ;;  %v1160_v0 = vcombine.high %v1134_v32, %v1142_v33  ;;  %v1176_v2 = vcombine.high %v1150_v34, %v1158_v35 }
 0x186   : > { %v977_v43 = vcombine.low %v949_v36, %v956_v37  ;;  %v2396_v44 = vcombine.high %v949_v36, %v956_v37  ;;  %v993_v45 = vcombine.low %v965_v38, %v972_v39  ;;  %v2397_v47 = vcombine.high %v965_v38, %v972_v39 }
 0x187   : > { %v1167_v48 = vrot.slane %v1159_v40, %v3160_v63  ;;  %v1183_v49 = vrot.slane %v1175_v41, %v3160_v63  ;;  %v1174_v5 = vrot.slane %v1160_v0, %v3160_v63  ;;  %v1190_v6 = vrot.slane %v1176_v2, %v3160_v63 }
 0x188   : > { %v984_v50 = vrot.slane %v977_v43, %v3158_v56  ;;  %v992_v51 = vrot.slane %v2396_v44, %v3158_v56  ;;  %v1000_v52 = vrot.slane %v993_v45, %v3158_v56  ;;  %v1008_v53 = vrot.slane %v2397_v47, %v3158_v56 }
 0x189   : > { %v1191_v54 = vcombine.low %v1167_v48, %v1183_v49  ;;  %v1192_v62 = vcombine.high %v1167_v48, %v1183_v49  ;;  %v1193_v9 = vcombine.low %v1174_v5, %v1190_v6  ;;  %v1194_v19 = vcombine.high %v1174_v5, %v1190_v6 }
 0x18a   : > { %v1009_v55 = vcombine.low %v984_v50, %v992_v51  ;;  %v1025_v57 = vcombine.low %v1000_v52, %v1008_v53  ;;  %v1010_v10 = vcombine.high %v984_v50, %v992_v51  ;;  %v1026_v11 = vcombine.high %v1000_v52, %v1008_v53 }
 0x18b   : > { %v1195_v58 = vpack.c.bf16 %v1191_v54, %v1191_v54  ;;  %v1196_v4 = vpack.c.bf16 %v1192_v62, %v1192_v62  ;;  %v1197_v13 = vpack.c.bf16 %v1193_v9, %v1193_v9  ;;  %v1198_v21 = vpack.c.bf16 %v1194_v19, %v1194_v19 }
 0x18c   : > { %v1017_v59 = vrot.slane %v1009_v55, %v3160_v63  ;;  %v1033_v60 = vrot.slane %v1025_v57, %v3160_v63  ;;  %v1024_v15 = vrot.slane %v1010_v10, %v3160_v63  ;;  %v1040_v17 = vrot.slane %v1026_v11, %v3160_v63 }
 0x18d   : > { %v1354_v61 = vsel %vm1349_vm1, %v1195_v58, 0  ;;  %v1400_v8 = vsel %vm1349_vm1, %v1196_v4, 0  ;;  %v1446_v18 = vsel %vm1349_vm1, %v1197_v13, 0  ;;  %v1492_v23 = vsel %vm1349_vm1, %v1198_v21, 0 }
 0x18e   : > { %2568 = vmatpush3.bf16.xpose.msra.mxu1 %v1354_v61  ;;  %v1041_v3 = vcombine.low %v1017_v59, %v1033_v60  ;;  %v1042_v12 = vcombine.high %v1017_v59, %v1033_v60  ;;  %v1043_v20 = vcombine.low %v1024_v15, %v1040_v17  ;;  %v1044_v24 = vcombine.high %v1024_v15, %v1040_v17 }
 0x18f   : > { %2573 = vmatprep.subr.bf16.mxu1 %v2868_v1 }
 0x190   : > { %v1045_v7 = vpack.c.bf16 %v1041_v3, %v1041_v3  ;;  %v1046_v14 = vpack.c.bf16 %v1042_v12, %v1042_v12  ;;  %v1047_v22 = vpack.c.bf16 %v1043_v20, %v1043_v20  ;;  %v1048_v25 = vpack.c.bf16 %v1044_v24, %v1044_v24 }
 0x195   : > { %2570 = vmatmul.mubr.msk.bf16.vlgmr.msra.gmra.mxu1 %vm1349_vm1, %v1045_v7  ;;  %v1201_v48 = vpop.permute.xlu0 %1200 }
 0x196   : > { %2574 = vmatpush3.bf16.xpose.msra.mxu1 %v1400_v8  ;;  %2575 = vmatprep.mubr.msk.bf16.mxu1 %vm2869_vm0, %v2868_v1 }
 0x197   : > { %2579 = vmatprep.subr.bf16.mxu1 %v2868_v1 }
 0x19d   : > { %2576 = vmatmul.mubr.msk.bf16.vlgmr.msra.gmra.mxu1 %vm1349_vm1, %v1046_v14 }
 0x19e   : > { %2580 = vmatpush3.bf16.xpose.msra.mxu1 %v1446_v18  ;;  %2581 = vmatprep.mubr.msk.bf16.mxu1 %vm2869_vm0, %v2868_v1 }
 0x19f   : > { %2585 = vmatprep.subr.bf16.mxu1 %v2868_v1 }
 0x1a5   : > { %2582 = vmatmul.mubr.msk.bf16.vlgmr.msra.gmra.mxu1 %vm1349_vm1, %v1047_v22 }
 0x1a6   : > { %2586 = vmatpush3.bf16.xpose.msra.mxu1 %v1492_v23  ;;  %2587 = vmatprep.mubr.msk.bf16.mxu1 %vm2869_vm0, %v2868_v1 }
 0x1a7   : > { %2597 = vmatprep.subr.bf16.mxu1 %v2868_v1 }
 0x1ad   : > { %2588 = vmatmul.mubr.msk.bf16.vlgmr.msra.gmra.mxu1 %vm1349_vm1, %v1048_v25 }
 0x1ae   : > { %2599 = vmatprep.mubr.msk.bf16.mxu1 %vm2869_vm0, %v2868_v1 }
 0x255   : > { %v1390_v26 = vpop.f32.mrf.mxu1 }
 0x256   : > { %v1534_v27 = vsel %vm1349_vm1, %v1390_v26, -inf }
 0x257   : > { %1535 = vmax.xlane.f32.xlu0 %v1534_v27  ;;  %v2571_v28 = vpop.f32.mrf.mxu1 }
 0x259   : > { %v1393_v29 = vpop.f32.mrf.mxu1 }
 0x25b   : > { %v2572_v30 = vpop.f32.mrf.mxu1 }
 0x25d   : > { %v1436_v31 = vpop.f32.mrf.mxu1 }
 0x25e   : > { %v1537_v32 = vsel %vm1349_vm1, %v1436_v31, -inf }
 0x25f   : > { %1538 = vmax.xlane.f32.xlu1 %v1537_v32  ;;  %v2577_v33 = vpop.f32.mrf.mxu1 }
 0x261   : > { %v1439_v34 = vpop.f32.mrf.mxu1 }
 0x263   : > { %v2578_v35 = vpop.f32.mrf.mxu1 }
 0x265   : > { %v3216_v36 = vpop.f32.mrf.mxu1 }
 0x266   : > { %v1540_v47 = vsel %vm1349_vm1, %v3216_v36, -inf }
 0x267   : > { %v2583_v37 = vpop.f32.mrf.mxu1 }
 0x269   : > { %v1485_v38 = vpop.f32.mrf.mxu1 }
 0x26b   : > { %v2584_v39 = vpop.f32.mrf.mxu1 }
 0x26d   : > { %1206 = vrot.lane.b32.xlu0 %v3154_v42, %s2870_s20  ;;  %v3220_v40 = vpop.f32.mrf.mxu1  ;;  %s2877_s20 = smov 24  }
 0x26e   : > { %v1543_v45 = vsel %vm1349_vm1, %v3220_v40, -inf }
 0x26f   : > { %v2589_v41 = vpop.f32.mrf.mxu1 }
 0x270   : > { %1203 = vrot.lane.b32.xlu1 %v3154_v42, %s2872_s29  ;;  %s2794_s29 = sshll.u32 %s2878_s19, 4  ;;  %s2795_s29 = int_to_ptr.vmem [resolvable:$false] %s2794_s29 }
 0x271   : > { %v1531_v43 = vpop.f32.mrf.mxu1  ;;  %s2796_s27 = scalar_lea.vmem %s2795_s29, 256 }
 0x273   : > { %v2590_v44 = vpop.f32.mrf.mxu1 }
 0x28c   : > { %1544 = vmax.xlane.f32.xlu0 %v1543_v45 }
 0x294   : > { %1541 = vmax.xlane.f32.xlu1 %v1540_v47 }
 0x2e0   : > { %v1536_v49 = vpop.xlane.xlu0 %1535 }
 0x2e1   : > { %v1546_v50 = vsub.f32 %v1390_v26, %v1536_v49 }
 0x2e3   : > { %v1550_v51 = vmul.f32 1.442695, %v1546_v50 }
 0x2e4   : > { %v1207_v52 = vpop.permute.xlu0 %1206 }
 0x2e5   : > { %2770 = vpow2.f32 %v1550_v51  ;;  %v1225_v55 = vcombine.low %v1201_v48, %v1207_v52  ;;  %v1226_v57 = vcombine.high %v1201_v48, %v1207_v52 }
 0x2e7   : > { %v1233_v62 = vrot.slane %v1225_v55, %v3158_v56  ;;  %v1240_v0 = vrot.slane %v1226_v57, %v3158_v56 }
 0x2e8   : > { %v1539_v53 = vpop.xlane.xlu1 %1538 }
 0x2e9   : > { %v1547_v54 = vsub.f32 %v1436_v31, %v1539_v53 }
 0x2eb   : > { %v1552_v58 = vmul.f32 1.442695, %v1547_v54 }
 0x2ec   : > { %v1204_v59 = vpop.permute.xlu1 %1203 }
 0x2ed   : > { %2772 = vpow2.f32 %v1552_v58  ;;  %v1209_v60 = vcombine.low %v3154_v42, %v1204_v59  ;;  %v1210_v61 = vcombine.high %v3154_v42, %v1204_v59 }
 0x2ef   : > { %v1217_v2 = vrot.slane %v1209_v60, %v3158_v56  ;;  %v1224_v3 = vrot.slane %v1210_v61, %v3158_v56 }
 0x2f1   : > { %v1241_v4 = vcombine.low %v1217_v2, %v1233_v62  ;;  %v1242_v5 = vcombine.high %v1217_v2, %v1233_v62  ;;  %v1257_v6 = vcombine.low %v1224_v3, %v1240_v0  ;;  %v1258_v7 = vcombine.high %v1224_v3, %v1240_v0 }
 0x2f2   : > { %v2771_v8 = vpop.eup %2770 }
 0x2f3   : > { %v1249_v9 = vrot.slane %v1241_v4, %v3160_v63  ;;  %v1256_v10 = vrot.slane %v1242_v5, %v3160_v63  ;;  %v1265_v11 = vrot.slane %v1257_v6, %v3160_v63  ;;  %v1272_v42 = vrot.slane %v1258_v7, %v3160_v63 }
 0x2f4   : > { %v1558_v12 = vsel %vm1349_vm1, %v2771_v8, 0.0  ;;  %v1570_v45 = vpack.c.bf16 %v2771_v8, %v2771_v8 }
 0x2f5   : > { %v1277_v13 = vcombine.low %v1249_v9, %v1256_v10  ;;  %v2400_v14 = vcombine.high %v1249_v9, %v1256_v10  ;;  %v1293_v15 = vcombine.low %v1265_v11, %v1272_v42  ;;  %v2401_v17 = vcombine.high %v1265_v11, %v1272_v42  ;;  %1559 = vadd.xlane.f32.xlu0 %v1558_v12 }
 0x2f7   : > { %v1284_v18 = vrot.slane %v1277_v13, %v3158_v56  ;;  %v1292_v19 = vrot.slane %v2400_v14, %v3158_v56  ;;  %v1300_v20 = vrot.slane %v1293_v15, %v3158_v56  ;;  %v1308_v21 = vrot.slane %v2401_v17, %v3158_v56 }
 0x2f9   : > { %v1309_v22 = vcombine.low %v1284_v18, %v1292_v19  ;;  %v1325_v23 = vcombine.low %v1300_v20, %v1308_v21  ;;  %v1310_v24 = vcombine.high %v1284_v18, %v1292_v19  ;;  %v1326_v25 = vcombine.high %v1300_v20, %v1308_v21 }
 0x2fa   : > { %v2773_v26 = vpop.eup %2772 }
 0x2fb   : > { %v1561_v27 = vsel %vm1349_vm1, %v2773_v26, 0.0  ;;  %v1317_v28 = vrot.slane %v1309_v22, %v3160_v63  ;;  %v1333_v29 = vrot.slane %v1325_v23, %v3160_v63  ;;  %v1324_v30 = vrot.slane %v1310_v24, %v3160_v63 }
 0x2fc   : > { %1562 = vadd.xlane.f32.xlu1 %v1561_v27  ;;  %v1340_v31 = vrot.slane %v1326_v25, %v3160_v63  ;;  %v1571_v47 = vpack.c.bf16 %v2773_v26, %v2773_v26 }
 0x2fd   : > { %v1341_v32 = vcombine.low %v1317_v28, %v1333_v29  ;;  %v1342_v33 = vcombine.high %v1317_v28, %v1333_v29 }
 0x2fe   : > { %v1343_v34 = vcombine.low %v1324_v30, %v1340_v31  ;;  %v1344_v35 = vcombine.high %v1324_v30, %v1340_v31 }
 0x2ff   : > { %v1345_v37 = vpack.c.bf16 %v1341_v32, %v1341_v32  ;;  %v1346_v38 = vpack.c.bf16 %v1342_v33, %v1342_v33 }
 0x300   : > { %v1347_v43 = vpack.c.bf16 %v1343_v34, %v1343_v34  ;;  %v1348_v44 = vpack.c.bf16 %v1344_v35, %v1344_v35 }
 0x301   : > { %v1579_v39 = vsel %vm1577_vm2, %v1345_v37, 0  ;;  %v1625_v41 = vsel %vm1577_vm2, %v1346_v38, 0 }
 0x302   : > { %2592 = vmatpush3.bf16.msra.mxu0 %v1579_v39  ;;  %2598 = vmatpush3.bf16.msra.mxu1 %v1625_v41  ;;  %v1671_v48 = vsel %vm1577_vm2, %v1347_v43, 0  ;;  %v1717_v49 = vsel %vm1577_vm2, %v1348_v44, 0  ;;  %v2752_v41 = vld [vmem:[%s3435_s7 + $0x8] sm:$0xff]  }
 0x303   : > { %2603 = vmatprep.subr.bf16.mxu0 %v2868_v1  ;;  %2609 = vmatprep.subr.bf16.mxu1 %v2868_v1 }
 0x305   : > { %2594 = vmatmul.mubr.msk.bf16.vlgmr.msra.gmra.mxu0 %vm1349_vm1, %v1570_v45  ;;  %2600 = vmatmul.mubr.msk.bf16.vlgmr.msra.gmra.mxu1 %vm1349_vm1, %v1571_v47 }
 0x306   : > { %2604 = vmatpush3.bf16.msra.mxu0 %v1671_v48  ;;  %2610 = vmatpush3.bf16.msra.mxu1 %v1717_v49 }
 0x307   : > { %2611 = vmatprep.mubr.msk.bf16.mxu1 %vm2869_vm0, %v2868_v1  ;;  %2605 = vmatprep.mubr.msk.bf16.mxu0 %vm2869_vm0, %v2868_v1 }
 0x308   : > { %2615 = vmatprep.subr.bf16.mxu0 %v2868_v1  ;;  %2623 = vmatprep.subr.bf16.mxu1 %v2868_v1 }
 0x315   : > { %v1545_v50 = vpop.xlane.xlu0 %1544 }
 0x316   : > { %v1549_v51 = vsub.f32 %v3220_v40, %v1545_v50 }
 0x318   : > { %v1556_v52 = vmul.f32 1.442695, %v1549_v51 }
 0x31a   : > { %2774 = vpow2.f32 %v1556_v52  ;;  %v2753_v52 = vld [vmem:[%s3435_s7] sm:$0xff]  }
 0x31d   : > { %v1542_v53 = vpop.xlane.xlu1 %1541 }
 0x31e   : > { %v1548_v54 = vsub.f32 %v3216_v36, %v1542_v53 }
 0x320   : > { %v1554_v55 = vmul.f32 1.442695, %v1548_v54 }
 0x322   : > { %2776 = vpow2.f32 %v1554_v55 }
 0x327   : > { %v2775_v57 = vpop.eup %2774 }
 0x328   : > { %v1567_v58 = vsel %vm1349_vm1, %v2775_v57, 0.0  ;;  %v1573_v59 = vpack.c.bf16 %v2775_v57, %v2775_v57 }
 0x329   : > { %1568 = vadd.xlane.f32.xlu1 %v1567_v58 }
 0x32a   : > { %2612 = vmatmul.mubr.msk.bf16.vlgmr.msra.gmra.mxu1 %vm1349_vm1, %v1573_v59 }
 0x32b   : > { %2639 = vmatprep.mubr.msk.bf16.mxu1 %vm2869_vm0, %v2868_v1 }
 0x32f   : > { %v2777_v60 = vpop.eup %2776 }
 0x330   : > { %v1564_v40 = vsel %vm1349_vm1, %v2777_v60, 0.0  ;;  %v1572_v61 = vpack.c.bf16 %v2777_v60, %v2777_v60 }
 0x331   : > { %1565 = vadd.xlane.f32.xlu0 %v1564_v40 }
 0x332   : > { %2606 = vmatmul.mubr.msk.bf16.vlgmr.msra.gmra.mxu0 %vm1349_vm1, %v1572_v61 }
 0x333   : > { %2619 = vmatprep.mubr.msk.bf16.mxu0 %vm2869_vm0, %v2868_v1  ;;  %2616 = vmatpush3.bf16.msra.mxu0 %v2752_v41 }
 0x334   : > { %2617 = vmatprep.subr.bf16.mxu0 %v2868_v1 }
 0x337   : > { %2618 = vmatpush3.bf16.msra.mxu0 %v2753_v52  ;;  %v2769_v52 = vld [vmem:[%s3441_s13] sm:$0xff]  }
 0x338   : > { %2643 = vmatprep.subr.bf16.mxu0 %v2868_v1 }
 0x37e   : > { %v1560_v8 = vpop.xlane.xlu0 %1559 }
 0x385   : > { %v1563_v7 = vpop.xlane.xlu1 %1562 }
 0x3b2   : > { %v1569_v9 = vpop.xlane.xlu1 %1568 }
 0x3b3   : > { %2778 = vrcp.f32 %v1569_v9 }
 0x3b4   : > { %2780 = vrcp.f32 %v1563_v7 }
 0x3b5   : > { %2782 = vrcp.f32 %v1560_v8 }
 0x3ba   : > { %v1566_v10 = vpop.xlane.xlu0 %1565 }
 0x3bb   : > { %2784 = vrcp.f32 %v1566_v10 }
 0x3c0   : > { %v2779_v12 = vpop.eup %2778 }
 0x3c1   : > { %v2781_v15 = vpop.eup %2780 }
 0x3c2   : > { %v2783_v18 = vpop.eup %2782 }
 0x3c5   : > { %v1615_v36 = vpop.f32.mrf.mxu0  ;;  %v1661_v62 = vpop.f32.mrf.mxu1 }
 0x3c6   : > { %v1764_v19 = vmul.f32 %v2781_v15, %v1661_v62  ;;  %v1763_v22 = vmul.f32 %v2783_v18, %v1615_v36  ;;  %v2754_v18 = vld [vmem:[%s3439_s11 + $0x38] sm:$0xff]  }
 0x3c7   : > { %v2595_v0 = vpop.f32.mrf.mxu0  ;;  %v2601_v2 = vpop.f32.mrf.mxu1  ;;  %2624 = vmatpush3.bf16.msra.mxu1 %v2754_v18 }
 0x3c8   : > { %v2785_v20 = vpop.eup %2784  ;;  %2625 = vmatprep.subr.bf16.mxu1 %v2868_v1 }
 0x3c9   : > { %v1618_v3 = vpop.f32.mrf.mxu0  ;;  %v1664_v4 = vpop.f32.mrf.mxu1 }
 0x3cb   : > { %v2596_v5 = vpop.f32.mrf.mxu0  ;;  %v2602_v6 = vpop.f32.mrf.mxu1 }
 0x3ea   : > { %v1753_v11 = vpop.f32.mrf.mxu1 }
 0x3eb   : > { %v1766_v14 = vmul.f32 %v2779_v12, %v1753_v11  ;;  %v2412_v11 = vld [vmem:[%s3436_s8] ss:$0 sm:$0xff] }
 0x3ec   : > { %v2613_v42 = vpop.f32.mrf.mxu1 }
 0x3ed   : > { %v1783_v23 = vcombine.low %v1764_v19, %v1766_v14  ;;  %v1784_v24 = vcombine.high %v1764_v19, %v1766_v14  ;;  %v2755_v19 = vld [vmem:[%s3439_s11 + $0x30] sm:$0xff]  }
 0x3ee   : > { %v1756_v13 = vpop.f32.mrf.mxu1  ;;  %2626 = vmatpush3.bf16.msra.mxu1 %v2755_v19 }
 0x3ef   : > { %v1791_v30 = vrot.slane %v1783_v23, %v3158_v56  ;;  %v1798_v31 = vrot.slane %v1784_v24, %v3158_v56  ;;  %2627 = vmatprep.subr.bf16.mxu1 %v2868_v1 }
 0x3f0   : > { %v2614_v17 = vpop.f32.mrf.mxu1 }
 0x3f2   : > { %v1707_v21 = vpop.f32.mrf.mxu0 }
 0x3f3   : > { %v1765_v25 = vmul.f32 %v2785_v20, %v1707_v21  ;;  %v1989_v20 = vand.u32 127, %v914_v46  ;;  %v2757_v46 = vld [vmem:[%s3439_s11 + $0x20] sm:$0xff]  }
 0x3f4   : > { %v2607_v26 = vpop.f32.mrf.mxu0 }
 0x3f5   : > { %v1767_v27 = vcombine.low %v1763_v22, %v1765_v25  ;;  %v1768_v28 = vcombine.high %v1763_v22, %v1765_v25  ;;  %vm1990_vm6 = vcmp.lt.s32.totalorder %v1989_v20, 32  ;;  %v2756_v26 = vld [vmem:[%s3439_s11 + $0x28] sm:$0xff]  }
 0x3f6   : > { %v1710_v29 = vpop.f32.mrf.mxu0  ;;  %v3313_v22 = vsel %vm1990_vm6, 1.0, %v2868_v1  ;;  %2628 = vmatpush3.bf16.msra.mxu1 %v2756_v26 }
 0x3f7   : > { %v1775_v32 = vrot.slane %v1767_v27, %v3158_v56  ;;  %v1782_v33 = vrot.slane %v1768_v28, %v3158_v56  ;;  %2629 = vmatprep.subr.bf16.mxu1 %v2868_v1  ;;  %v2758_v27 = vld [vmem:[%s3439_s11 + $0x18] sm:$0xff]   ;;  %v2759_v28 = vld [vmem:[%s3439_s11 + $0x10] sm:$0xff]   ;;  %v2760_v29 = vld [vmem:[%s3439_s11 + $0x8] sm:$0xff]  }
 0x3f8   : > { %v2608_v34 = vpop.f32.mrf.mxu0 }
 0x3f9   : > { %v1799_v35 = vcombine.low %v1775_v32, %v1791_v30  ;;  %v1800_v37 = vcombine.high %v1775_v32, %v1791_v30  ;;  %v1815_v38 = vcombine.low %v1782_v33, %v1798_v31  ;;  %v1816_v39 = vcombine.high %v1782_v33, %v1798_v31  ;;  %v2761_v30 = vld [vmem:[%s3439_s11] sm:$0xff]   ;;  %v2762_v31 = vld [vmem:[%s3441_s13 + $0x38] sm:$0xff]   ;;  %v2763_v32 = vld [vmem:[%s3441_s13 + $0x30] sm:$0xff]  }
 0x3fa   : > { %2630 = vmatpush3.bf16.msra.mxu1 %v2757_v46  ;;  %v2764_v33 = vld [vmem:[%s3441_s13 + $0x28] sm:$0xff]   ;;  %v2765_v34 = vld [vmem:[%s3441_s13 + $0x20] sm:$0xff]  }
 0x3fb   : > { %v1807_v43 = vrot.slane %v1799_v35, %v3160_v63  ;;  %v1814_v44 = vrot.slane %v1800_v37, %v3160_v63  ;;  %v1823_v45 = vrot.slane %v1815_v38, %v3160_v63  ;;  %v1830_v47 = vrot.slane %v1816_v39, %v3160_v63  ;;  %2631 = vmatprep.subr.bf16.mxu1 %v2868_v1  ;;  %v2766_v35 = vld [vmem:[%s3441_s13 + $0x18] sm:$0xff]   ;;  %v2767_v37 = vld [vmem:[%s3441_s13 + $0x10] sm:$0xff]  }
 0x3fd   : > { %v1835_v48 = vcombine.low %v1807_v43, %v1814_v44  ;;  %v2410_v49 = vcombine.high %v1807_v43, %v1814_v44  ;;  %v1851_v50 = vcombine.low %v1823_v45, %v1830_v47  ;;  %v2411_v51 = vcombine.high %v1823_v45, %v1830_v47  ;;  %v2417_v44 = vld [vmem:[%s3437_s9] ss:$0 sm:$0xff] }
 0x3fe   : > { %2632 = vmatpush3.bf16.msra.mxu1 %v2758_v27  ;;  %v2418_v47 = vld [vmem:[%s3438_s10] ss:$0 sm:$0xff] }
 0x3ff   : > { %v1842_v53 = vrot.slane %v1835_v48, %v3158_v56  ;;  %v1850_v54 = vrot.slane %v2410_v49, %v3158_v56  ;;  %v1858_v55 = vrot.slane %v1851_v50, %v3158_v56  ;;  %v1866_v57 = vrot.slane %v2411_v51, %v3158_v56  ;;  %2633 = vmatprep.subr.bf16.mxu1 %v2868_v1  ;;  %v2768_v51 = vld [vmem:[%s3441_s13 + $0x8] sm:$0xff]  }
 0x401   : > { %v1868_v58 = vcombine.high %v1842_v53, %v1850_v54  ;;  %v1884_v59 = vcombine.high %v1858_v55, %v1866_v57  ;;  %v1867_v60 = vcombine.low %v1842_v53, %v1850_v54  ;;  %v1883_v40 = vcombine.low %v1858_v55, %v1866_v57  ;;  %v2419_v53 = vld [vmem:[%s3440_s12] ss:$0 sm:$0xff] }
 0x402   : > { %2634 = vmatpush3.bf16.msra.mxu1 %v2759_v28 }
 0x403   : > { %v1882_v61 = vrot.slane %v1868_v58, %v3160_v63  ;;  %v1898_v36 = vrot.slane %v1884_v59, %v3160_v63  ;;  %v1875_v62 = vrot.slane %v1867_v60, %v3160_v63  ;;  %v1891_v0 = vrot.slane %v1883_v40, %v3160_v63  ;;  %2635 = vmatprep.subr.bf16.mxu1 %v2868_v1 }
 0x405   : > { %v1901_v2 = vcombine.low %v1882_v61, %v1898_v36  ;;  %v1900_v3 = vcombine.high %v1875_v62, %v1891_v0  ;;  %v1899_v4 = vcombine.low %v1875_v62, %v1891_v0  ;;  %v1902_v56 = vcombine.high %v1882_v61, %v1898_v36 }
 0x406   : > { %2636 = vmatpush3.bf16.msra.mxu1 %v2760_v29 }
 0x407   : > { %1908 = vrot.lane.b32.xlu1 %v1901_v2, %s2875_s24  ;;  %1904 = vrot.lane.b32.xlu0 %v1900_v3, %s2876_s21  ;;  %s551_s21 = sand.u32 1, %s2850_s25  }
 0x408   : > { %2637 = vmatprep.subr.bf16.mxu1 %v2868_v1  ;;  %s2278_s3 = scalar_lea.sflag [#allocation3], %s551_s21 }
 0x40a   : > { %2638 = vmatpush3.bf16.msra.mxu1 %v2761_v30 }
 0x40b   : > { %1912 = vrot.lane.b32.xlu1 %v1902_v56, %s2877_s20  ;;  %s2367_s20 = sshll.u32 %s551_s21, 3 }
 0x40c   : > { %s553_s26 = scalar_lea.vmem [#allocation2], %s2367_s20 }
 0x40d   : > { %s2292_s22 = sshll.u32 %s553_s26, 4  ;;  %s2293_s22 = int_to_ptr.vmem [resolvable:$true] %s2292_s22 }
 0x40e   : > { %s2790_s4 = scalar_lea.vmem %s2293_s22, 128  ;;  %p2797_p1 = scmp.lt.s32.totalorder %s2293_s22, %s2795_s29 }
 0x40f   : > { %p2791_p12 = scmp.ne.s32.totalorder %s2293_s22, %s2790_s4  ;;  %p2798_p2 = scmp.lt.s32.totalorder %s2796_s27, %s2790_s4 }
 0x411   : > { %p2792_p13 = pnand %p2791_p12, %p3009_p4  ;;  %p2799_p3 = por %p2798_p2, %p2797_p1 }
 0x413   : > { %p2793_p0 = pneg %p2792_p13 }
 0x415   : > { %p2800_p5 = pnand %p2799_p3, %p2793_p0 }
 0x479   : > { %v1909_v5 = vpop.permute.xlu1 %1908  ;;  %v1905_v6 = vpop.permute.xlu0 %1904 }
 0x47a   : > { %v1915_v7 = vsel %vm1349_vm1, %v1899_v4, %v1905_v6 }
 0x47b   : > { %v1917_v9 = vsel %vm1916_vm3, %v1915_v7, %v1909_v5 }
 0x47d   : > { %v1913_v8 = vpop.permute.xlu1 %1912 }
 0x47e   : > { %v1919_v10 = vsel %vm1918_vm4, %v1917_v9, %v1913_v8 }
 0x47f   : > { %v1920_v63 = vpack.c.bf16 %v1919_v10, %v1919_v10 }
 0x481   : > { %2620 = vmatmul.mubr.msk.bf16.vlgmr.msra.gmra.mxu0 %vm1944_vm5, %v1920_v63 }
 0x482   : > { %2659 = vmatprep.mubr.msk.bf16.mxu0 %vm2869_vm0, %v2868_v1  ;;  %2644 = vmatpush3.bf16.msra.mxu0 %v2762_v31 }
 0x483   : > { %2645 = vmatprep.subr.bf16.mxu0 %v2868_v1 }
 0x486   : > { %2646 = vmatpush3.bf16.msra.mxu0 %v2763_v32 }
 0x487   : > { %2647 = vmatprep.subr.bf16.mxu0 %v2868_v1 }
 0x48a   : > { %2648 = vmatpush3.bf16.msra.mxu0 %v2764_v33 }
 0x48b   : > { %2649 = vmatprep.subr.bf16.mxu0 %v2868_v1 }
 0x48e   : > { %2650 = vmatpush3.bf16.msra.mxu0 %v2765_v34 }
 0x48f   : > { %2651 = vmatprep.subr.bf16.mxu0 %v2868_v1 }
 0x492   : > { %2652 = vmatpush3.bf16.msra.mxu0 %v2766_v35 }
 0x493   : > { %2653 = vmatprep.subr.bf16.mxu0 %v2868_v1 }
 0x496   : > { %2654 = vmatpush3.bf16.msra.mxu0 %v2767_v37 }
 0x497   : > { %2655 = vmatprep.subr.bf16.mxu0 %v2868_v1 }
 0x49a   : > { %2656 = vmatpush3.bf16.msra.mxu0 %v2768_v51 }
 0x49b   : > { %2657 = vmatprep.subr.bf16.mxu0 %v2868_v1  ;;  %v2428_v1 = vld [vmem:[%s3442_s14] ss:$0 sm:$0xff] }
 0x49e   : > { %2658 = vmatpush3.bf16.msra.mxu0 %v2769_v52 }
 0x541   : > { %v1982_v42 = vpop.f32.mrf.mxu0 }
 0x542   : > { %v1983_v12 = vadd.f32 %v2412_v11, %v1982_v42  ;;  %v2437_v11 = vld [vmem:[%s3443_s15] ss:$0 sm:$0xff] }
 0x543   : > { %v2621_v13 = vpop.f32.mrf.mxu0 }
 0x544   : > { %v1993_v14 = vadd.f32 %v1983_v12, %v3092_v16  ;;  %v2438_v12 = vld [vmem:[%s3444_s16] ss:$0 sm:$0xff] }
 0x545   : > { %v1985_v15 = vpop.f32.mrf.mxu0 }
 0x546   : > { %1996 = vadd.xlane.f32.xlu0 %v1993_v14 }
 0x547   : > { %v2622_v17 = vpop.f32.mrf.mxu0 }
 0x5cf   : > { %v1997_v16 = vpop.xlane.xlu0 %1996 }
 0x5d0   : > { %v1998_v21 = vmul.f32 0.03125, %v1997_v16 }
 0x5d2   : > { %v1999_v23 = vsub.f32 %v1993_v14, %v1998_v21 }
 0x5d4   : > { %v2000_v24 = vmul.f32 %v3313_v22, %v1999_v23 }
 0x5d6   : > { %v2001_v25 = vmul.f32 %v2000_v24, %v2000_v24 }
 0x5d8   : > { %2002 = vadd.xlane.f32.xlu1 %v2001_v25 }
 0x661   : > { %v2003_v38 = vpop.xlane.xlu1 %2002 }
 0x662   : > { %v2004_v39 = vmul.f32 0.03125, %v2003_v38 }
 0x664   : > { %v2005_v41 = vadd.f32 1e-05, %v2004_v39 }
 0x666   : > { %2786 = vrsqrt.f32 %v2005_v41 }
 0x673   : > { %v2787_v43 = vpop.eup %2786 }
 0x674   : > { %v2007_v45 = vmul.f32 %v2787_v43, %v2000_v24 }
 0x676   : > { %v2014_v48 = vmul.f32 %v2417_v44, %v2007_v45 }
 0x678   : > { %v2021_v49 = vadd.f32 %v2418_v47, %v2014_v48 }
 0x67a   : > { %v2022_v50 = vpack.c.bf16 %v2021_v49, %v2021_v49 }
 0x67c   : > { %2640 = vmatmul.mubr.bf16.vlgmr.msra.gmra.mxu1 %v2022_v50 }
 0x73c   : > { %v2128_v54 = vpop.f32.mrf.mxu1 }
 0x73d   : > { %v2129_v55 = vadd.f32 %v2419_v53, %v2128_v54 }
 0x73e   : > { %v2641_v57 = vpop.f32.mrf.mxu1 }
 0x73f   : > { %v2134_v58 = vmax.f32 %v2129_v55, 0.0 }
 0x740   : > { %v2131_v59 = vpop.f32.mrf.mxu1 }
 0x741   : > { %v2135_v60 = vpack.c.bf16 %v2134_v58, %v2134_v58 }
 0x742   : > { %v2642_v40 = vpop.f32.mrf.mxu1 }
 0x743   : > { %2660 = vmatmul.mubr.bf16.vlgmr.msra.gmra.mxu0 %v2135_v60 }
 0x803   : > { %v2241_v61 = vpop.f32.mrf.mxu0 }
 0x804   : > { %v2242_v36 = vadd.f32 %v2428_v1, %v2241_v61 }
 0x805   : > { %v2661_v62 = vpop.f32.mrf.mxu0 }
 0x806   : > { %v2247_v0 = vadd.f32 %v2242_v36, %v2021_v49 }
 0x807   : > { %v2244_v2 = vpop.f32.mrf.mxu0 }
 0x808   : > { %2250 = vadd.xlane.f32.xlu0 %v2247_v0 }
 0x809   : > { %v2662_v3 = vpop.f32.mrf.mxu0 }
 0x891   : > { %v2251_v4 = vpop.xlane.xlu0 %2250 }
 0x892   : > { %v2252_v56 = vmul.f32 0.03125, %v2251_v4 }
 0x894   : > { %v2253_v5 = vsub.f32 %v2247_v0, %v2252_v56 }
 0x896   : > { %v2254_v6 = vmul.f32 %v3313_v22, %v2253_v5 }
 0x898   : > { %v2255_v7 = vmul.f32 %v2254_v6, %v2254_v6 }
 0x89a   : > { %2256 = vadd.xlane.f32.xlu0 %v2255_v7 }
 0x923   : > { %v2257_v8 = vpop.xlane.xlu0 %2256 }
 0x924   : > { %v2258_v9 = vmul.f32 0.03125, %v2257_v8 }
 0x926   : > { %v2259_v10 = vadd.f32 1e-05, %v2258_v9 }
 0x928   : > { %2788 = vrsqrt.f32 %v2259_v10 }
 0x935   : > { %v2789_v63 = vpop.eup %2788 }
 0x936   : > { %v2261_v42 = vmul.f32 %v2789_v63, %v2254_v6 }
 0x938   : > { %v2268_v13 = vmul.f32 %v2437_v11, %v2261_v42 }
 0x93a   : > { %v2275_v14 = vadd.f32 %v2438_v12, %v2268_v13 }
 0x93c   : > { %2276 = vst [vmem:[%s553_s26] sm:$0xff] %v2275_v14 }
 0x93d   : > { %2803 = shalt.err (!%p2800_p5)
}
 0x93e   : > { %s2804_s20 = scalar_lea.hbm %s2290_s2, 128  ;;  %s2808_s23 = scalar_lea.hbm %s3445_s17, 256 }
 0x93f   : > { %p2805_p6 = scmp.ne.s32.totalorder %s2290_s2, %s2804_s20  ;;  %p2809_p10 = scmp.lt.s32.totalorder %s2290_s2, %s3445_s17 }
 0x940   : > { %p2810_p11 = scmp.lt.s32.totalorder %s2808_s23, %s2804_s20 }
 0x941   : > { %p2806_p7 = pnand %p2805_p6, %p3009_p4 }
 0x942   : > { %p2811_p12 = por %p2810_p11, %p2809_p10 }
 0x943   : > { %p2807_p9 = pneg %p2806_p7 }
 0x945   : > { %p2812_p13 = pnand %p2811_p12, %p2807_p9 }
 0x947   : > { %2815 = shalt.err (!%p2812_p13)
}
 0x948   : > { %2663 = dma.vmem_to_hbm [thread:$0]  (%p3009_p4), %s2293_s22, 128, %s2290_s2, %s2278_s3  }
 0x949 PF: > { %s3473_s4 = sld [smem:[#allocation8_spill]] }
 0x94a   : > { %s3474_s28 = sld [smem:[#allocation5_spill]] }
 0x94f   : > { %p2669_p0 = scmp.ge.s32.totalorder %s3473_s4, 2 }
 0x950   : > { %s2304_s19 = sand.u32 1, %s3474_s28  }
 0x951   : > { %p2666_p1 = pnand %p2669_p0, %p3016_p8  ;;  %s2305_s29 = scalar_lea.sflag [#allocation3], %s2304_s19 }
 0x953   : > { %p2667_p2 = pneg %p2666_p1 }
 0x955   : > { %2841 = dma.done.wait (%p2667_p2), %s2305_s29, 128  }
 0x956   : > { %2843 = vsyncadd (%p2667_p2), %s2305_s29, 4294967168  ;;  %s30_s29 = sadd.s32 1, %s3473_s4   ;;  %s3476_s27 = sld [smem:[#allocation6_spill]] }
 0x957   : > { %p27_p3 = scmp.ge.s32.totalorder %s30_s29, 4   ;;  %s3477_s26 = sld [smem:[#allocation11_spill]] }
 0x958   : > { %s3478_s1 = sld [smem:[#allocation7_spill]]  ;;  %s3480_s24 = smov %s2850_s25 }
 0x959   : > { %s3479_s28 = sld [smem:[#allocation9_spill]] }
 0x95a   :  { %29 = sbr.rel (!%p27_p3) target bundleno = 10 (0xa), region = 124 }
 0x95c   : > { %s3481_s25 = smov %s3476_s27 }
 0x95e   : > { %s3482_s27 = smov %s3478_s1 }
 0x95f   :  { %2310 = vsyncpa [#allocation3], 1 }
 0x960   :  { %2312 = vsyncpa [#allocation3 + $0x1], 1 }

</bundles_post_ra>
